<compile_context>
chip_gen: v7x
topology: tpu7x:2x2x1
jax: 0.10.0
libtpu: 0.0.40
codegen_flags: <defaults>
</compile_context>

<pallas_src>
import functools

import jax
import jax.numpy as jnp
from jax import lax
from jax.experimental import pallas as pl
from jax.experimental.pallas import tpu as pltpu


def _layernorm(x, eps=1e-6):
    mu = jnp.mean(x, axis=-1, keepdims=True)
    var = jnp.mean((x - mu) ** 2, axis=-1, keepdims=True)
    return (x - mu) * lax.rsqrt(var + eps)


def _gelu_tanh(x):
    c = 0.7978845608028654  # sqrt(2/pi)
    return 0.5 * x * (1.0 + jnp.tanh(c * (x + 0.044715 * x * x * x)))


def dv_block_kernel(xq_ref, xf_ref, wq_ref, wk_ref, wv_ref, bq_ref, bk_ref,
                    bv_ref, wo_ref, bo_ref, w1_ref, b1_ref, w2_ref, b2_ref,
                    o_ref, k_sc, v_sc, acc_sc, *, n_heads, exp_bf16):
    qi = pl.program_id(1)
    _, TQ, E = o_ref.shape
    L = xf_ref.shape[1]
    D = E // n_heads
    H4 = w1_ref.shape[1]
    bf16 = jnp.bfloat16
    f32 = jnp.float32

    # ---- K / V for the whole sequence, once per batch element, in TQ-row
    #      chunks so no full-(L,E) f32 intermediate is ever live ----
    @pl.when(qi == 0)
    def _():
        @pl.loop(0, L // TQ)
        def _(c):
            s0 = pl.multiple_of(c * TQ, TQ)
            xc = xf_ref[0, pl.ds(s0, TQ), :]                          # (TQ,E) bf16
            kc = jnp.dot(xc, wk_ref[...], preferred_element_type=f32) + bk_ref[...]
            vc = jnp.dot(xc, wv_ref[...], preferred_element_type=f32) + bv_ref[...]
            k_sc[pl.ds(s0, TQ), :] = kc.astype(bf16)
            v_sc[pl.ds(s0, TQ), :] = vc.astype(bf16)

    # ---- Q projection for this query tile (1/sqrt(D) pre-folded into wq/bq) ----
    xq = xq_ref[0]                                                    # (TQ,E) f32
    q = jnp.dot(xq.astype(bf16), wq_ref[...],
                preferred_element_type=f32) + bq_ref[...]
    q = q.astype(bf16)

    # ---- per-head attention: online softmax blocked over L (key tile TK=TQ),
    #      streaming resident bf16 K/V scratch; context written into acc_sc ----
    TK = TQ
    n_kv = L // TK
    for h in range(n_heads):                      # static loop over heads
        sl = slice(h * D, (h + 1) * D)
        qh = q[:, sl]                             # (TQ,D) bf16

        def kv_step(c, carry):
            m, l, acc = carry
            s0 = pl.multiple_of(c * TK, TK)
            kh = k_sc[pl.ds(s0, TK), sl]          # (TK,D) bf16
            vh = v_sc[pl.ds(s0, TK), sl]          # (TK,D) bf16
            s = jnp.einsum('qd,kd->qk', qh, kh,
                           preferred_element_type=f32)                # (TQ,TK)
            m_new = jnp.maximum(m, jnp.max(s, axis=-1, keepdims=True))
            alpha = jnp.exp(m - m_new)
            if exp_bf16:                          # bf16 EUP on v6e/v7x
                p = jnp.exp((s - m_new).astype(bf16))
            else:                                 # f32 on v5e (no bf16 EUP)
                p = jnp.exp(s - m_new)
            l = alpha * l + jnp.sum(p.astype(f32), axis=-1, keepdims=True)
            acc = alpha * acc + jnp.dot(p.astype(bf16), vh,
                                        preferred_element_type=f32)
            return m_new, l, acc

        m0 = jnp.full((TQ, 1), -jnp.inf, f32)
        l0 = jnp.zeros((TQ, 1), f32)
        a0 = jnp.zeros((TQ, D), f32)
        _m, l, acc = lax.fori_loop(0, n_kv, kv_step, (m0, l0, a0))
        # NOTE: D is not 128-aligned in general -> masked stores here; see review.
        acc_sc[:, sl] = acc * pl.reciprocal(l, approx=True)

    attn = jnp.dot(acc_sc[...].astype(bf16), wo_ref[...],
                   preferred_element_type=f32) + bo_ref[...]

    # ---- post-norm 1 ----
    y = _layernorm(xq + attn)
    y_bf = y.astype(bf16)

    # ---- MLP: Linear(E,4E) -> GELU(tanh) -> Linear(4E,E), chunked over 4E,
    #      accumulated into VMEM scratch (acc_sc is dead after the wo matmul) ----
    CW = 512 if (H4 > 512 and H4 % 512 == 0) else H4
    for c in range(H4 // CW):                     # static loop, static slices
        csl = slice(c * CW, (c + 1) * CW)
        hmid = jnp.dot(y_bf, w1_ref[:, csl],
                       preferred_element_type=f32) + b1_ref[:, csl]
        hmid = _gelu_tanh(hmid).astype(bf16)
        contrib = jnp.dot(hmid, w2_ref[csl, :], preferred_element_type=f32)
        if c == 0:
            acc_sc[...] = contrib
        else:
            acc_sc[...] += contrib
    mlp = acc_sc[...] + b2_ref[...]

    # ---- post-norm 2 ----
    o_ref[0] = _layernorm(y + mlp).astype(o_ref.dtype)


def dv_transformer_block(x, kparams, n_heads, tq=None):
    """x: (B, L, E) f32. kparams: bf16/scale-folded params from prepare_kernel_params."""
    B, L, E = x.shape
    assert E % n_heads == 0, "hidden_size must be divisible by n_heads"
    (wq, wk, wv, bq, bk, bv, wo, bo, w1, b1, w2, b2) = kparams
    H4 = w1.shape[1]

    # Light hardware detection; every fallback is safe on any generation.
    try:
        kind = jax.devices()[0].device_kind.lower()
    except Exception:
        kind = ""
    is_v7 = "v7" in kind
    exp_bf16 = ("v6" in kind) or is_v7
    vmem_limit = (56 if is_v7 else 100) * 1024 * 1024

    if tq is None:
        tq = 128 if is_v7 else 256
    TQ = min(L, tq)
    assert L % TQ == 0, "L must be divisible by the query tile"
    QI = L // TQ

    # bf16 view of x feeds only the K/V projection (Q / residual stay f32).
    x_bf = x.astype(jnp.bfloat16)

    rep = lambda b, qi: (0, 0)
    # Constant-index weights/biases: DMA'd once, single-buffered (half the VMEM).
    w_spec = lambda shp: pl.BlockSpec(shp, rep, pipeline_mode=pl.Buffered(1))

    kernel = functools.partial(dv_block_kernel, n_heads=n_heads,
                               exp_bf16=exp_bf16)

    # Advisory cost estimate so XLA can schedule around the custom call.
    flops = (2 * B * L * E * (3 * E)       # qkv projections
             + 4 * B * L * L * E           # QK^T + PV over all heads
             + 2 * B * L * E * E           # out projection
             + 4 * B * L * E * H4)         # MLP (two matmuls)
    trans = B * n_heads * L * L + B * L * H4
    bytes_acc = (B * L * E * (4 + 2 + 4)   # x f32 + x bf16 + out f32
                 + 12 * E * E * 2          # bf16 weights
                 + (3 * E + E + H4 + E) * 4)
    cost = pl.CostEstimate(flops=int(flops), transcendentals=int(trans),
                           bytes_accessed=int(bytes_acc))

    return pl.pallas_call(
        kernel,
        out_shape=jax.ShapeDtypeStruct((B, L, E), x.dtype),
        grid_spec=pltpu.PrefetchScalarGridSpec(
            num_scalar_prefetch=0,
            grid=(B, QI),
            in_specs=[
                pl.BlockSpec((1, TQ, E), lambda b, qi: (b, qi, 0)),  # x tile (f32)
                pl.BlockSpec((1, L, E), lambda b, qi: (b, 0, 0)),    # x full (bf16)
                w_spec((E, E)),                                      # wq
                w_spec((E, E)),                                      # wk
                w_spec((E, E)),                                      # wv
                w_spec((1, E)),                                      # bq
                w_spec((1, E)),                                      # bk
                w_spec((1, E)),                                      # bv
                w_spec((E, E)),                                      # wo
                w_spec((1, E)),                                      # bo
                w_spec((E, H4)),                                     # w1
                w_spec((1, H4)),                                     # b1
                w_spec((H4, E)),                                     # w2
                w_spec((1, E)),                                      # b2
            ],
            out_specs=pl.BlockSpec((1, TQ, E), lambda b, qi: (b, qi, 0)),
            scratch_shapes=[
                pltpu.VMEM((L, E), jnp.bfloat16),    # K (whole sequence)
                pltpu.VMEM((L, E), jnp.bfloat16),    # V (whole sequence)
                pltpu.VMEM((TQ, E), jnp.float32),    # ctx slab / MLP accumulator
            ],
        ),
        compiler_params=pltpu.CompilerParams(
            dimension_semantics=("parallel", "arbitrary"),
            vmem_limit_bytes=vmem_limit,
        ),
        cost_estimate=cost,
    )(x, x_bf, wq, wk, wv, bq, bk, bv, wo, bo, w1, b1, w2, b2)


def init_params(key, hidden_size):
    """f32 kernel-layout params (x @ W convention); used by the pure-JAX reference."""
    E = hidden_size
    ks = jax.random.split(key, 8)
    # PyTorch layouts: in_proj_weight (3E,E), out_proj (E,E), mlp W1 (4E,E), W2 (E,4E).
    in_proj_w = 0.05 * jax.random.normal(ks[0], (3 * E, E), jnp.float32)
    in_proj_b = 0.05 * jax.random.normal(ks[1], (3 * E,), jnp.float32)
    out_proj_w = 0.05 * jax.random.normal(ks[2], (E, E), jnp.float32)
    out_proj_b = 0.05 * jax.random.normal(ks[3], (E,), jnp.float32)
    mlp_w1 = 0.05 * jax.random.normal(ks[4], (4 * E, E), jnp.float32)
    mlp_b1 = 0.05 * jax.random.normal(ks[5], (4 * E,), jnp.float32)
    mlp_w2 = 0.05 * jax.random.normal(ks[6], (E, 4 * E), jnp.float32)
    mlp_b2 = 0.05 * jax.random.normal(ks[7], (E,), jnp.float32)

    wq = in_proj_w[0 * E:1 * E].T            # (E, E)
    wk = in_proj_w[1 * E:2 * E].T
    wv = in_proj_w[2 * E:3 * E].T
    bq = in_proj_b[0 * E:1 * E].reshape(1, E)
    bk = in_proj_b[1 * E:2 * E].reshape(1, E)
    bv = in_proj_b[2 * E:3 * E].reshape(1, E)
    wo = out_proj_w.T                        # (E, E)
    bo = out_proj_b.reshape(1, E)
    w1 = mlp_w1.T                            # (E, 4E)
    b1 = mlp_b1.reshape(1, 4 * E)
    w2 = mlp_w2.T                            # (4E, E)
    b2 = mlp_b2.reshape(1, E)
    return (wq, wk, wv, bq, bk, bv, wo, bo, w1, b1, w2, b2)


def prepare_kernel_params(params, n_heads):
    """One-time prep: fold 1/sqrt(D) into wq/bq, cast matmul weights to bf16."""
    (wq, wk, wv, bq, bk, bv, wo, bo, w1, b1, w2, b2) = params
    E = wq.shape[0]
    scale = 1.0 / float(E // n_heads) ** 0.5
    bf = jnp.bfloat16
    return ((wq * scale).astype(bf), wk.astype(bf), wv.astype(bf),
            bq * scale, bk, bv,
            wo.astype(bf), bo,
            w1.astype(bf), b1, w2.astype(bf), b2)


def ref_forward(x, params, n_heads):
    """Pure-JAX f32 reference mirroring the PyTorch forward (norm_type='post')."""
    (wq, wk, wv, bq, bk, bv, wo, bo, w1, b1, w2, b2) = params
    B, L, E = x.shape
    D = E // n_heads
    q = x @ wq + bq
    k = x @ wk + bk
    v = x @ wv + bv
    qh = q.reshape(B, L, n_heads, D).transpose(0, 2, 1, 3)
    kh = k.reshape(B, L, n_heads, D).transpose(0, 2, 1, 3)
    vh = v.reshape(B, L, n_heads, D).transpose(0, 2, 1, 3)
    s = jnp.einsum('bhld,bhmd->bhlm', qh, kh) / jnp.sqrt(jnp.float32(D))
    p = jax.nn.softmax(s, axis=-1)
    ctx = jnp.einsum('bhlm,bhmd->bhld', p, vh).transpose(0, 2, 1, 3).reshape(B, L, E)
    attn = ctx @ wo + bo

    def ln(z):
        mu = z.mean(-1, keepdims=True)
        var = ((z - mu) ** 2).mean(-1, keepdims=True)
        return (z - mu) / jnp.sqrt(var + 1e-6)

    y = ln(x + attn)
    m = jax.nn.gelu(y @ w1 + b1, approximate=True) @ w2 + b2
    return ln(y + m)


if __name__ == "__main__":
    B, L, E, H = 2, 8, 32, 4
    key = jax.random.PRNGKey(0)
    kx, kp = jax.random.split(key)
    x = jax.random.normal(kx, (B, L, E), jnp.float32)
    params = init_params(kp, E)
    kparams = prepare_kernel_params(params, H)   # bf16 weights prepared once

    out = dv_transformer_block(x, kparams, n_heads=H)
    out = jax.block_until_ready(out)

    ref = ref_forward(x, params, n_heads=H)
    assert out.shape == (B, L, E)
    # bf16 matmul operands + approx reciprocal + online softmax vs pure-f32 ref.
    assert jnp.allclose(out, ref, atol=2e-2, rtol=2e-2), \
        f"max abs diff {jnp.max(jnp.abs(out - ref))}"

    print("KERNEL_OK")
</pallas_src>

<mosaic_0001>
module attributes {stable_mosaic.version = 11 : i64} {
  func.func @dv_block_kernel(%arg0: i32, %arg1: i32, %arg2: memref<1x8x32xf32, #tpu.memory_space<vmem>>, %arg3: memref<1x8x32xbf16, #tpu.memory_space<vmem>>, %arg4: memref<32x32xbf16, #tpu.memory_space<vmem>>, %arg5: memref<32x32xbf16, #tpu.memory_space<vmem>>, %arg6: memref<32x32xbf16, #tpu.memory_space<vmem>>, %arg7: memref<1x32xf32, #tpu.memory_space<vmem>>, %arg8: memref<1x32xf32, #tpu.memory_space<vmem>>, %arg9: memref<1x32xf32, #tpu.memory_space<vmem>>, %arg10: memref<32x32xbf16, #tpu.memory_space<vmem>>, %arg11: memref<1x32xf32, #tpu.memory_space<vmem>>, %arg12: memref<32x128xbf16, #tpu.memory_space<vmem>>, %arg13: memref<1x128xf32, #tpu.memory_space<vmem>>, %arg14: memref<128x32xbf16, #tpu.memory_space<vmem>>, %arg15: memref<1x32xf32, #tpu.memory_space<vmem>>, %arg16: memref<1x8x32xf32, #tpu.memory_space<vmem>>, %arg17: memref<8x32xbf16, #tpu.memory_space<vmem>>, %arg18: memref<8x32xbf16, #tpu.memory_space<vmem>>, %arg19: memref<8x32xf32, #tpu.memory_space<vmem>>) attributes {dimension_semantics = [#tpu.dimension_semantics<parallel>, #tpu.dimension_semantics<arbitrary>], iteration_bounds = array<i64: 2, 1>, scalar_prefetch = 0 : i64, scratch_operands = 3 : i64, tpu.core_type = #tpu.core_type<tc>, window_params = [{transform_indices = @transform_0, window_bounds = array<i64: 1, 8, 32>}, {transform_indices = @transform_1, window_bounds = array<i64: 1, 8, 32>}, {pipeline_mode = #tpu.pipeline_mode<synchronous>, transform_indices = @transform_2, window_bounds = array<i64: 32, 32>}, {pipeline_mode = #tpu.pipeline_mode<synchronous>, transform_indices = @transform_3, window_bounds = array<i64: 32, 32>}, {pipeline_mode = #tpu.pipeline_mode<synchronous>, transform_indices = @transform_4, window_bounds = array<i64: 32, 32>}, {pipeline_mode = #tpu.pipeline_mode<synchronous>, transform_indices = @transform_5, window_bounds = array<i64: 1, 32>}, {pipeline_mode = #tpu.pipeline_mode<synchronous>, transform_indices = @transform_6, window_bounds = array<i64: 1, 32>}, {pipeline_mode = #tpu.pipeline_mode<synchronous>, transform_indices = @transform_7, window_bounds = array<i64: 1, 32>}, {pipeline_mode = #tpu.pipeline_mode<synchronous>, transform_indices = @transform_8, window_bounds = array<i64: 32, 32>}, {pipeline_mode = #tpu.pipeline_mode<synchronous>, transform_indices = @transform_9, window_bounds = array<i64: 1, 32>}, {pipeline_mode = #tpu.pipeline_mode<synchronous>, transform_indices = @transform_10, window_bounds = array<i64: 32, 128>}, {pipeline_mode = #tpu.pipeline_mode<synchronous>, transform_indices = @transform_11, window_bounds = array<i64: 1, 128>}, {pipeline_mode = #tpu.pipeline_mode<synchronous>, transform_indices = @transform_12, window_bounds = array<i64: 128, 32>}, {pipeline_mode = #tpu.pipeline_mode<synchronous>, transform_indices = @transform_13, window_bounds = array<i64: 1, 32>}, {transform_indices = @transform_14, window_bounds = array<i64: 1, 8, 32>}]} {
    %c0_i32 = arith.constant 0 : i32
    %0 = arith.cmpi eq, %arg1, %c0_i32 : i32
    %1 = arith.extui %0 : i1 to i32
    %c0_i32_0 = arith.constant 0 : i32
    %2 = arith.cmpi ne, %1, %c0_i32_0 : i32
    scf.if %2 {
      %c0_i32_96 = arith.constant 0 : i32
      %c1_i32_97 = arith.constant 1 : i32
      %215 = arith.muli %c0_i32_96, %c1_i32_97 : i32
      %c0_i32_98 = arith.constant 0 : i32
      %216 = arith.addi %c0_i32_98, %215 : i32
      %c8_i32_99 = arith.constant 8 : i32
      %217 = arith.muli %216, %c8_i32_99 : i32
      %218 = tpu.assume_multiple %217, 8 : i32
      %c0_100 = arith.constant 0 : index
      %219 = arith.index_cast %218 : i32 to index
      %c0_101 = arith.constant 0 : index
      %220 = vector.load %arg3[%c0_100, %219, %c0_101] : memref<1x8x32xbf16, #tpu.memory_space<vmem>>, vector<1x8x32xbf16>
      %221 = vector.shape_cast %220 : vector<1x8x32xbf16> to vector<8x32xbf16>
      %c0_102 = arith.constant 0 : index
      %c0_103 = arith.constant 0 : index
      %222 = vector.load %arg5[%c0_102, %c0_103] : memref<32x32xbf16, #tpu.memory_space<vmem>>, vector<32x32xbf16>
      %cst_104 = arith.constant dense<0.000000e+00> : vector<8x32xf32>
      %223 = tpu.matmul %221, %222, %cst_104 {dimension_numbers = #tpu.dot_dimension_numbers<[1], [0], [0], [1], [0, 0, 1, 1], [], []>} : vector<8x32xbf16>, vector<32x32xbf16>, vector<8x32xf32> -> vector<8x32xf32>
      %c0_105 = arith.constant 0 : index
      %c0_106 = arith.constant 0 : index
      %224 = vector.load %arg8[%c0_105, %c0_106] : memref<1x32xf32, #tpu.memory_space<vmem>>, vector<1x32xf32>
      %225 = vector.broadcast %224 : vector<1x32xf32> to vector<8x32xf32>
      %226 = arith.addf %223, %225 : vector<8x32xf32>
      %c0_107 = arith.constant 0 : index
      %c0_108 = arith.constant 0 : index
      %227 = vector.load %arg6[%c0_107, %c0_108] : memref<32x32xbf16, #tpu.memory_space<vmem>>, vector<32x32xbf16>
      %cst_109 = arith.constant dense<0.000000e+00> : vector<8x32xf32>
      %228 = tpu.matmul %221, %227, %cst_109 {dimension_numbers = #tpu.dot_dimension_numbers<[1], [0], [0], [1], [0, 0, 1, 1], [], []>} : vector<8x32xbf16>, vector<32x32xbf16>, vector<8x32xf32> -> vector<8x32xf32>
      %c0_110 = arith.constant 0 : index
      %c0_111 = arith.constant 0 : index
      %229 = vector.load %arg9[%c0_110, %c0_111] : memref<1x32xf32, #tpu.memory_space<vmem>>, vector<1x32xf32>
      %230 = vector.broadcast %229 : vector<1x32xf32> to vector<8x32xf32>
      %231 = arith.addf %228, %230 : vector<8x32xf32>
      %232 = arith.truncf %226 : vector<8x32xf32> to vector<8x32xbf16>
      %233 = arith.index_cast %218 : i32 to index
      %c0_112 = arith.constant 0 : index
      %234 = vector.load %arg17[%233, %c0_112] : memref<8x32xbf16, #tpu.memory_space<vmem>>, vector<8x32xbf16>
      tpu.vector_store %arg17[%233, %c0_112], %232 {strides = array<i32>} : memref<8x32xbf16, #tpu.memory_space<vmem>>, vector<8x32xbf16>,
      %235 = arith.truncf %231 : vector<8x32xf32> to vector<8x32xbf16>
      %236 = arith.index_cast %218 : i32 to index
      %c0_113 = arith.constant 0 : index
      %237 = vector.load %arg18[%236, %c0_113] : memref<8x32xbf16, #tpu.memory_space<vmem>>, vector<8x32xbf16>
      tpu.vector_store %arg18[%236, %c0_113], %235 {strides = array<i32>} : memref<8x32xbf16, #tpu.memory_space<vmem>>, vector<8x32xbf16>,
      %c1_i32_114 = arith.constant 1 : i32
    } else {
    }
    %c0 = arith.constant 0 : index
    %c0_1 = arith.constant 0 : index
    %c0_2 = arith.constant 0 : index
    %3 = vector.load %arg2[%c0, %c0_1, %c0_2] : memref<1x8x32xf32, #tpu.memory_space<vmem>>, vector<1x8x32xf32>
    %4 = vector.shape_cast %3 : vector<1x8x32xf32> to vector<8x32xf32>
    %5 = arith.truncf %4 : vector<8x32xf32> to vector<8x32xbf16>
    %c0_3 = arith.constant 0 : index
    %c0_4 = arith.constant 0 : index
    %6 = vector.load %arg4[%c0_3, %c0_4] : memref<32x32xbf16, #tpu.memory_space<vmem>>, vector<32x32xbf16>
    %cst = arith.constant dense<0.000000e+00> : vector<8x32xf32>
    %7 = tpu.matmul %5, %6, %cst {dimension_numbers = #tpu.dot_dimension_numbers<[1], [0], [0], [1], [0, 0, 1, 1], [], []>} : vector<8x32xbf16>, vector<32x32xbf16>, vector<8x32xf32> -> vector<8x32xf32>
    %c0_5 = arith.constant 0 : index
    %c0_6 = arith.constant 0 : index
    %8 = vector.load %arg7[%c0_5, %c0_6] : memref<1x32xf32, #tpu.memory_space<vmem>>, vector<1x32xf32>
    %9 = vector.broadcast %8 : vector<1x32xf32> to vector<8x32xf32>
    %10 = arith.addf %7, %9 : vector<8x32xf32>
    %11 = arith.truncf %10 : vector<8x32xf32> to vector<8x32xbf16>
    %12 = vector.extract_strided_slice %11 {offsets = [0, 0], sizes = [8, 8], strides = [1, 1]} : vector<8x32xbf16> to vector<8x8xbf16>
    %cst_7 = arith.constant 0xFF800000 : f32
    %13 = vector.broadcast %cst_7 : f32 to vector<8x1xf32>
    %cst_8 = arith.constant 0.000000e+00 : f32
    %14 = vector.broadcast %cst_8 : f32 to vector<8x1xf32>
    %cst_9 = arith.constant 0.000000e+00 : f32
    %15 = vector.broadcast %cst_9 : f32 to vector<8x8xf32>
    %c0_i32_10 = arith.constant 0 : i32
    %c8_i32 = arith.constant 8 : i32
    %16 = arith.muli %c0_i32_10, %c8_i32 : i32
    %17 = tpu.assume_multiple %16, 8 : i32
    %18 = arith.index_cast %17 : i32 to index
    %c0_11 = arith.constant 0 : index
    %19 = vector.load %arg17[%18, %c0_11] : memref<8x32xbf16, #tpu.memory_space<vmem>>, vector<8x8xbf16>
    %20 = arith.index_cast %17 : i32 to index
    %c0_12 = arith.constant 0 : index
    %21 = vector.load %arg18[%20, %c0_12] : memref<8x32xbf16, #tpu.memory_space<vmem>>, vector<8x8xbf16>
    "tpu.trace_start"() <{level = 10 : i32, message = "qd,kd->qk"}> : () -> ()
    %cst_13 = arith.constant dense<0.000000e+00> : vector<8x8xf32>
    %22 = tpu.matmul %12, %19, %cst_13 {dimension_numbers = #tpu.dot_dimension_numbers<[1], [1], [0], [0], [0, 0, 1, 0], [], []>} : vector<8x8xbf16>, vector<8x8xbf16>, vector<8x8xf32> -> vector<8x8xf32>
    "tpu.trace_stop"() : () -> ()
    %cst_14 = arith.constant dense<0xFF800000> : vector<8xf32>
    %23 = vector.multi_reduction <maximumf>, %22, %cst_14 [1] : vector<8x8xf32> to vector<8xf32>
    %24 = vector.shape_cast %23 : vector<8xf32> to vector<8x1xf32>
    %25 = arith.maximumf %13, %24 : vector<8x1xf32>
    %26 = arith.subf %13, %25 : vector<8x1xf32>
    %27 = math.exp %26 : vector<8x1xf32>
    %28 = vector.broadcast %25 : vector<8x1xf32> to vector<8x8xf32>
    %29 = arith.subf %22, %28 : vector<8x8xf32>
    %30 = math.exp %29 : vector<8x8xf32>
    %31 = arith.mulf %27, %14 : vector<8x1xf32>
    %cst_15 = arith.constant dense<0.000000e+00> : vector<8xf32>
    %32 = vector.multi_reduction <add>, %30, %cst_15 [1] : vector<8x8xf32> to vector<8xf32>
    %33 = vector.shape_cast %32 : vector<8xf32> to vector<8x1xf32>
    %34 = arith.addf %31, %33 : vector<8x1xf32>
    %35 = vector.broadcast %27 : vector<8x1xf32> to vector<8x8xf32>
    %36 = arith.mulf %35, %15 : vector<8x8xf32>
    %37 = arith.truncf %30 : vector<8x8xf32> to vector<8x8xbf16>
    %cst_16 = arith.constant dense<0.000000e+00> : vector<8x8xf32>
    %38 = tpu.matmul %37, %21, %cst_16 {dimension_numbers = #tpu.dot_dimension_numbers<[1], [0], [0], [1], [0, 0, 1, 1], [], []>} : vector<8x8xbf16>, vector<8x8xbf16>, vector<8x8xf32> -> vector<8x8xf32>
    %39 = arith.addf %36, %38 : vector<8x8xf32>
    %c1_i32 = arith.constant 1 : i32
    %40 = tpu.reciprocal %34 {approx = true} : vector<8x1xf32> -> vector<8x1xf32>
    %41 = vector.broadcast %40 : vector<8x1xf32> to vector<8x8xf32>
    %42 = arith.mulf %39, %41 : vector<8x8xf32>
    %c0_17 = arith.constant 0 : index
    %c0_18 = arith.constant 0 : index
    %43 = vector.load %arg19[%c0_17, %c0_18] : memref<8x32xf32, #tpu.memory_space<vmem>>, vector<8x8xf32>
    tpu.vector_store %arg19[%c0_17, %c0_18], %42 {strides = array<i32>} : memref<8x32xf32, #tpu.memory_space<vmem>>, vector<8x8xf32>,
    %44 = vector.extract_strided_slice %11 {offsets = [0, 8], sizes = [8, 8], strides = [1, 1]} : vector<8x32xbf16> to vector<8x8xbf16>
    %cst_19 = arith.constant 0xFF800000 : f32
    %45 = vector.broadcast %cst_19 : f32 to vector<8x1xf32>
    %cst_20 = arith.constant 0.000000e+00 : f32
    %46 = vector.broadcast %cst_20 : f32 to vector<8x1xf32>
    %cst_21 = arith.constant 0.000000e+00 : f32
    %47 = vector.broadcast %cst_21 : f32 to vector<8x8xf32>
    %c0_i32_22 = arith.constant 0 : i32
    %c8_i32_23 = arith.constant 8 : i32
    %48 = arith.muli %c0_i32_22, %c8_i32_23 : i32
    %49 = tpu.assume_multiple %48, 8 : i32
    %50 = arith.index_cast %49 : i32 to index
    %c8 = arith.constant 8 : index
    %51 = vector.load %arg17[%50, %c8] : memref<8x32xbf16, #tpu.memory_space<vmem>>, vector<8x8xbf16>
    %52 = arith.index_cast %49 : i32 to index
    %c8_24 = arith.constant 8 : index
    %53 = vector.load %arg18[%52, %c8_24] : memref<8x32xbf16, #tpu.memory_space<vmem>>, vector<8x8xbf16>
    "tpu.trace_start"() <{level = 10 : i32, message = "qd,kd->qk"}> : () -> ()
    %cst_25 = arith.constant dense<0.000000e+00> : vector<8x8xf32>
    %54 = tpu.matmul %44, %51, %cst_25 {dimension_numbers = #tpu.dot_dimension_numbers<[1], [1], [0], [0], [0, 0, 1, 0], [], []>} : vector<8x8xbf16>, vector<8x8xbf16>, vector<8x8xf32> -> vector<8x8xf32>
    "tpu.trace_stop"() : () -> ()
    %cst_26 = arith.constant dense<0xFF800000> : vector<8xf32>
    %55 = vector.multi_reduction <maximumf>, %54, %cst_26 [1] : vector<8x8xf32> to vector<8xf32>
    %56 = vector.shape_cast %55 : vector<8xf32> to vector<8x1xf32>
    %57 = arith.maximumf %45, %56 : vector<8x1xf32>
    %58 = arith.subf %45, %57 : vector<8x1xf32>
    %59 = math.exp %58 : vector<8x1xf32>
    %60 = vector.broadcast %57 : vector<8x1xf32> to vector<8x8xf32>
    %61 = arith.subf %54, %60 : vector<8x8xf32>
    %62 = math.exp %61 : vector<8x8xf32>
    %63 = arith.mulf %59, %46 : vector<8x1xf32>
    %cst_27 = arith.constant dense<0.000000e+00> : vector<8xf32>
    %64 = vector.multi_reduction <add>, %62, %cst_27 [1] : vector<8x8xf32> to vector<8xf32>
    %65 = vector.shape_cast %64 : vector<8xf32> to vector<8x1xf32>
    %66 = arith.addf %63, %65 : vector<8x1xf32>
    %67 = vector.broadcast %59 : vector<8x1xf32> to vector<8x8xf32>
    %68 = arith.mulf %67, %47 : vector<8x8xf32>
    %69 = arith.truncf %62 : vector<8x8xf32> to vector<8x8xbf16>
    %cst_28 = arith.constant dense<0.000000e+00> : vector<8x8xf32>
    %70 = tpu.matmul %69, %53, %cst_28 {dimension_numbers = #tpu.dot_dimension_numbers<[1], [0], [0], [1], [0, 0, 1, 1], [], []>} : vector<8x8xbf16>, vector<8x8xbf16>, vector<8x8xf32> -> vector<8x8xf32>
    %71 = arith.addf %68, %70 : vector<8x8xf32>
    %c1_i32_29 = arith.constant 1 : i32
    %72 = tpu.reciprocal %66 {approx = true} : vector<8x1xf32> -> vector<8x1xf32>
    %73 = vector.broadcast %72 : vector<8x1xf32> to vector<8x8xf32>
    %74 = arith.mulf %71, %73 : vector<8x8xf32>
    %c0_30 = arith.constant 0 : index
    %c8_31 = arith.constant 8 : index
    %75 = vector.load %arg19[%c0_30, %c8_31] : memref<8x32xf32, #tpu.memory_space<vmem>>, vector<8x8xf32>
    tpu.vector_store %arg19[%c0_30, %c8_31], %74 {strides = array<i32>} : memref<8x32xf32, #tpu.memory_space<vmem>>, vector<8x8xf32>,
    %76 = vector.extract_strided_slice %11 {offsets = [0, 16], sizes = [8, 8], strides = [1, 1]} : vector<8x32xbf16> to vector<8x8xbf16>
    %cst_32 = arith.constant 0xFF800000 : f32
    %77 = vector.broadcast %cst_32 : f32 to vector<8x1xf32>
    %cst_33 = arith.constant 0.000000e+00 : f32
    %78 = vector.broadcast %cst_33 : f32 to vector<8x1xf32>
    %cst_34 = arith.constant 0.000000e+00 : f32
    %79 = vector.broadcast %cst_34 : f32 to vector<8x8xf32>
    %c0_i32_35 = arith.constant 0 : i32
    %c8_i32_36 = arith.constant 8 : i32
    %80 = arith.muli %c0_i32_35, %c8_i32_36 : i32
    %81 = tpu.assume_multiple %80, 8 : i32
    %82 = arith.index_cast %81 : i32 to index
    %c16 = arith.constant 16 : index
    %83 = vector.load %arg17[%82, %c16] : memref<8x32xbf16, #tpu.memory_space<vmem>>, vector<8x8xbf16>
    %84 = arith.index_cast %81 : i32 to index
    %c16_37 = arith.constant 16 : index
    %85 = vector.load %arg18[%84, %c16_37] : memref<8x32xbf16, #tpu.memory_space<vmem>>, vector<8x8xbf16>
    "tpu.trace_start"() <{level = 10 : i32, message = "qd,kd->qk"}> : () -> ()
    %cst_38 = arith.constant dense<0.000000e+00> : vector<8x8xf32>
    %86 = tpu.matmul %76, %83, %cst_38 {dimension_numbers = #tpu.dot_dimension_numbers<[1], [1], [0], [0], [0, 0, 1, 0], [], []>} : vector<8x8xbf16>, vector<8x8xbf16>, vector<8x8xf32> -> vector<8x8xf32>
    "tpu.trace_stop"() : () -> ()
    %cst_39 = arith.constant dense<0xFF800000> : vector<8xf32>
    %87 = vector.multi_reduction <maximumf>, %86, %cst_39 [1] : vector<8x8xf32> to vector<8xf32>
    %88 = vector.shape_cast %87 : vector<8xf32> to vector<8x1xf32>
    %89 = arith.maximumf %77, %88 : vector<8x1xf32>
    %90 = arith.subf %77, %89 : vector<8x1xf32>
    %91 = math.exp %90 : vector<8x1xf32>
    %92 = vector.broadcast %89 : vector<8x1xf32> to vector<8x8xf32>
    %93 = arith.subf %86, %92 : vector<8x8xf32>
    %94 = math.exp %93 : vector<8x8xf32>
    %95 = arith.mulf %91, %78 : vector<8x1xf32>
    %cst_40 = arith.constant dense<0.000000e+00> : vector<8xf32>
    %96 = vector.multi_reduction <add>, %94, %cst_40 [1] : vector<8x8xf32> to vector<8xf32>
    %97 = vector.shape_cast %96 : vector<8xf32> to vector<8x1xf32>
    %98 = arith.addf %95, %97 : vector<8x1xf32>
    %99 = vector.broadcast %91 : vector<8x1xf32> to vector<8x8xf32>
    %100 = arith.mulf %99, %79 : vector<8x8xf32>
    %101 = arith.truncf %94 : vector<8x8xf32> to vector<8x8xbf16>
    %cst_41 = arith.constant dense<0.000000e+00> : vector<8x8xf32>
    %102 = tpu.matmul %101, %85, %cst_41 {dimension_numbers = #tpu.dot_dimension_numbers<[1], [0], [0], [1], [0, 0, 1, 1], [], []>} : vector<8x8xbf16>, vector<8x8xbf16>, vector<8x8xf32> -> vector<8x8xf32>
    %103 = arith.addf %100, %102 : vector<8x8xf32>
    %c1_i32_42 = arith.constant 1 : i32
    %104 = tpu.reciprocal %98 {approx = true} : vector<8x1xf32> -> vector<8x1xf32>
    %105 = vector.broadcast %104 : vector<8x1xf32> to vector<8x8xf32>
    %106 = arith.mulf %103, %105 : vector<8x8xf32>
    %c0_43 = arith.constant 0 : index
    %c16_44 = arith.constant 16 : index
    %107 = vector.load %arg19[%c0_43, %c16_44] : memref<8x32xf32, #tpu.memory_space<vmem>>, vector<8x8xf32>
    tpu.vector_store %arg19[%c0_43, %c16_44], %106 {strides = array<i32>} : memref<8x32xf32, #tpu.memory_space<vmem>>, vector<8x8xf32>,
    %108 = vector.extract_strided_slice %11 {offsets = [0, 24], sizes = [8, 8], strides = [1, 1]} : vector<8x32xbf16> to vector<8x8xbf16>
    %cst_45 = arith.constant 0xFF800000 : f32
    %109 = vector.broadcast %cst_45 : f32 to vector<8x1xf32>
    %cst_46 = arith.constant 0.000000e+00 : f32
    %110 = vector.broadcast %cst_46 : f32 to vector<8x1xf32>
    %cst_47 = arith.constant 0.000000e+00 : f32
    %111 = vector.broadcast %cst_47 : f32 to vector<8x8xf32>
    %c0_i32_48 = arith.constant 0 : i32
    %c8_i32_49 = arith.constant 8 : i32
    %112 = arith.muli %c0_i32_48, %c8_i32_49 : i32
    %113 = tpu.assume_multiple %112, 8 : i32
    %114 = arith.index_cast %113 : i32 to index
    %c24 = arith.constant 24 : index
    %115 = vector.load %arg17[%114, %c24] : memref<8x32xbf16, #tpu.memory_space<vmem>>, vector<8x8xbf16>
    %116 = arith.index_cast %113 : i32 to index
    %c24_50 = arith.constant 24 : index
    %117 = vector.load %arg18[%116, %c24_50] : memref<8x32xbf16, #tpu.memory_space<vmem>>, vector<8x8xbf16>
    "tpu.trace_start"() <{level = 10 : i32, message = "qd,kd->qk"}> : () -> ()
    %cst_51 = arith.constant dense<0.000000e+00> : vector<8x8xf32>
    %118 = tpu.matmul %108, %115, %cst_51 {dimension_numbers = #tpu.dot_dimension_numbers<[1], [1], [0], [0], [0, 0, 1, 0], [], []>} : vector<8x8xbf16>, vector<8x8xbf16>, vector<8x8xf32> -> vector<8x8xf32>
    "tpu.trace_stop"() : () -> ()
    %cst_52 = arith.constant dense<0xFF800000> : vector<8xf32>
    %119 = vector.multi_reduction <maximumf>, %118, %cst_52 [1] : vector<8x8xf32> to vector<8xf32>
    %120 = vector.shape_cast %119 : vector<8xf32> to vector<8x1xf32>
    %121 = arith.maximumf %109, %120 : vector<8x1xf32>
    %122 = arith.subf %109, %121 : vector<8x1xf32>
    %123 = math.exp %122 : vector<8x1xf32>
    %124 = vector.broadcast %121 : vector<8x1xf32> to vector<8x8xf32>
    %125 = arith.subf %118, %124 : vector<8x8xf32>
    %126 = math.exp %125 : vector<8x8xf32>
    %127 = arith.mulf %123, %110 : vector<8x1xf32>
    %cst_53 = arith.constant dense<0.000000e+00> : vector<8xf32>
    %128 = vector.multi_reduction <add>, %126, %cst_53 [1] : vector<8x8xf32> to vector<8xf32>
    %129 = vector.shape_cast %128 : vector<8xf32> to vector<8x1xf32>
    %130 = arith.addf %127, %129 : vector<8x1xf32>
    %131 = vector.broadcast %123 : vector<8x1xf32> to vector<8x8xf32>
    %132 = arith.mulf %131, %111 : vector<8x8xf32>
    %133 = arith.truncf %126 : vector<8x8xf32> to vector<8x8xbf16>
    %cst_54 = arith.constant dense<0.000000e+00> : vector<8x8xf32>
    %134 = tpu.matmul %133, %117, %cst_54 {dimension_numbers = #tpu.dot_dimension_numbers<[1], [0], [0], [1], [0, 0, 1, 1], [], []>} : vector<8x8xbf16>, vector<8x8xbf16>, vector<8x8xf32> -> vector<8x8xf32>
    %135 = arith.addf %132, %134 : vector<8x8xf32>
    %c1_i32_55 = arith.constant 1 : i32
    %136 = tpu.reciprocal %130 {approx = true} : vector<8x1xf32> -> vector<8x1xf32>
    %137 = vector.broadcast %136 : vector<8x1xf32> to vector<8x8xf32>
    %138 = arith.mulf %135, %137 : vector<8x8xf32>
    %c0_56 = arith.constant 0 : index
    %c24_57 = arith.constant 24 : index
    %139 = vector.load %arg19[%c0_56, %c24_57] : memref<8x32xf32, #tpu.memory_space<vmem>>, vector<8x8xf32>
    tpu.vector_store %arg19[%c0_56, %c24_57], %138 {strides = array<i32>} : memref<8x32xf32, #tpu.memory_space<vmem>>, vector<8x8xf32>,
    %c0_58 = arith.constant 0 : index
    %c0_59 = arith.constant 0 : index
    %140 = vector.load %arg19[%c0_58, %c0_59] : memref<8x32xf32, #tpu.memory_space<vmem>>, vector<8x32xf32>
    %141 = arith.truncf %140 : vector<8x32xf32> to vector<8x32xbf16>
    %c0_60 = arith.constant 0 : index
    %c0_61 = arith.constant 0 : index
    %142 = vector.load %arg10[%c0_60, %c0_61] : memref<32x32xbf16, #tpu.memory_space<vmem>>, vector<32x32xbf16>
    %cst_62 = arith.constant dense<0.000000e+00> : vector<8x32xf32>
    %143 = tpu.matmul %141, %142, %cst_62 {dimension_numbers = #tpu.dot_dimension_numbers<[1], [0], [0], [1], [0, 0, 1, 1], [], []>} : vector<8x32xbf16>, vector<32x32xbf16>, vector<8x32xf32> -> vector<8x32xf32>
    %c0_63 = arith.constant 0 : index
    %c0_64 = arith.constant 0 : index
    %144 = vector.load %arg11[%c0_63, %c0_64] : memref<1x32xf32, #tpu.memory_space<vmem>>, vector<1x32xf32>
    %145 = vector.broadcast %144 : vector<1x32xf32> to vector<8x32xf32>
    %146 = arith.addf %143, %145 : vector<8x32xf32>
    %147 = arith.addf %4, %146 : vector<8x32xf32>
    %cst_65 = arith.constant dense<0.000000e+00> : vector<8xf32>
    %148 = vector.multi_reduction <add>, %147, %cst_65 [1] : vector<8x32xf32> to vector<8xf32>
    %149 = vector.shape_cast %148 : vector<8xf32> to vector<8x1xf32>
    %cst_66 = arith.constant 3.200000e+01 : f32
    %150 = vector.broadcast %cst_66 : f32 to vector<8x1xf32>
    %151 = arith.divf %149, %150 : vector<8x1xf32>
    %152 = vector.broadcast %151 : vector<8x1xf32> to vector<8x32xf32>
    %153 = arith.subf %147, %152 : vector<8x32xf32>
    %154 = arith.mulf %153, %153 : vector<8x32xf32>
    %cst_67 = arith.constant dense<0.000000e+00> : vector<8xf32>
    %155 = vector.multi_reduction <add>, %154, %cst_67 [1] : vector<8x32xf32> to vector<8xf32>
    %156 = vector.shape_cast %155 : vector<8xf32> to vector<8x1xf32>
    %cst_68 = arith.constant 3.200000e+01 : f32
    %157 = vector.broadcast %cst_68 : f32 to vector<8x1xf32>
    %158 = arith.divf %156, %157 : vector<8x1xf32>
    %159 = vector.broadcast %151 : vector<8x1xf32> to vector<8x32xf32>
    %160 = arith.subf %147, %159 : vector<8x32xf32>
    %cst_69 = arith.constant 9.99999997E-7 : f32
    %161 = vector.broadcast %cst_69 : f32 to vector<8x1xf32>
    %162 = arith.addf %158, %161 : vector<8x1xf32>
    %163 = math.rsqrt %162 : vector<8x1xf32>
    %164 = vector.broadcast %163 : vector<8x1xf32> to vector<8x32xf32>
    %165 = arith.mulf %160, %164 : vector<8x32xf32>
    %166 = arith.truncf %165 : vector<8x32xf32> to vector<8x32xbf16>
    %c0_70 = arith.constant 0 : index
    %c0_71 = arith.constant 0 : index
    %167 = vector.load %arg12[%c0_70, %c0_71] : memref<32x128xbf16, #tpu.memory_space<vmem>>, vector<32x128xbf16>
    %cst_72 = arith.constant dense<0.000000e+00> : vector<8x128xf32>
    %168 = tpu.matmul %166, %167, %cst_72 {dimension_numbers = #tpu.dot_dimension_numbers<[1], [0], [0], [1], [0, 0, 1, 1], [], []>} : vector<8x32xbf16>, vector<32x128xbf16>, vector<8x128xf32> -> vector<8x128xf32>
    %c0_73 = arith.constant 0 : index
    %c0_74 = arith.constant 0 : index
    %169 = vector.load %arg13[%c0_73, %c0_74] : memref<1x128xf32, #tpu.memory_space<vmem>>, vector<1x128xf32>
    %170 = vector.broadcast %169 : vector<1x128xf32> to vector<8x128xf32>
    %171 = arith.addf %168, %170 : vector<8x128xf32>
    %cst_75 = arith.constant 5.000000e-01 : f32
    %172 = vector.broadcast %cst_75 : f32 to vector<8x128xf32>
    %173 = arith.mulf %172, %171 : vector<8x128xf32>
    %cst_76 = arith.constant 4.471500e-02 : f32
    %174 = vector.broadcast %cst_76 : f32 to vector<8x128xf32>
    %175 = arith.mulf %174, %171 : vector<8x128xf32>
    %176 = arith.mulf %175, %171 : vector<8x128xf32>
    %177 = arith.mulf %176, %171 : vector<8x128xf32>
    %178 = arith.addf %171, %177 : vector<8x128xf32>
    %cst_77 = arith.constant 0.797884583 : f32
    %179 = vector.broadcast %cst_77 : f32 to vector<8x128xf32>
    %180 = arith.mulf %179, %178 : vector<8x128xf32>
    %181 = math.tanh %180 : vector<8x128xf32>
    %cst_78 = arith.constant 1.000000e+00 : f32
    %182 = vector.broadcast %cst_78 : f32 to vector<8x128xf32>
    %183 = arith.addf %182, %181 : vector<8x128xf32>
    %184 = arith.mulf %173, %183 : vector<8x128xf32>
    %185 = arith.truncf %184 : vector<8x128xf32> to vector<8x128xbf16>
    %c0_79 = arith.constant 0 : index
    %c0_80 = arith.constant 0 : index
    %186 = vector.load %arg14[%c0_79, %c0_80] : memref<128x32xbf16, #tpu.memory_space<vmem>>, vector<128x32xbf16>
    %cst_81 = arith.constant dense<0.000000e+00> : vector<8x32xf32>
    %187 = tpu.matmul %185, %186, %cst_81 {dimension_numbers = #tpu.dot_dimension_numbers<[1], [0], [0], [1], [0, 0, 1, 1], [], []>} : vector<8x128xbf16>, vector<128x32xbf16>, vector<8x32xf32> -> vector<8x32xf32>
    %c0_82 = arith.constant 0 : index
    %c0_83 = arith.constant 0 : index
    %188 = vector.load %arg19[%c0_82, %c0_83] : memref<8x32xf32, #tpu.memory_space<vmem>>, vector<8x32xf32>
    tpu.vector_store %arg19[%c0_82, %c0_83], %187 {strides = array<i32>} : memref<8x32xf32, #tpu.memory_space<vmem>>, vector<8x32xf32>,
    %c0_84 = arith.constant 0 : index
    %c0_85 = arith.constant 0 : index
    %189 = vector.load %arg19[%c0_84, %c0_85] : memref<8x32xf32, #tpu.memory_space<vmem>>, vector<8x32xf32>
    %c0_86 = arith.constant 0 : index
    %c0_87 = arith.constant 0 : index
    %190 = vector.load %arg15[%c0_86, %c0_87] : memref<1x32xf32, #tpu.memory_space<vmem>>, vector<1x32xf32>
    %191 = vector.broadcast %190 : vector<1x32xf32> to vector<8x32xf32>
    %192 = arith.addf %189, %191 : vector<8x32xf32>
    %193 = arith.addf %165, %192 : vector<8x32xf32>
    %cst_88 = arith.constant dense<0.000000e+00> : vector<8xf32>
    %194 = vector.multi_reduction <add>, %193, %cst_88 [1] : vector<8x32xf32> to vector<8xf32>
    %195 = vector.shape_cast %194 : vector<8xf32> to vector<8x1xf32>
    %cst_89 = arith.constant 3.200000e+01 : f32
    %196 = vector.broadcast %cst_89 : f32 to vector<8x1xf32>
    %197 = arith.divf %195, %196 : vector<8x1xf32>
    %198 = vector.broadcast %197 : vector<8x1xf32> to vector<8x32xf32>
    %199 = arith.subf %193, %198 : vector<8x32xf32>
    %200 = arith.mulf %199, %199 : vector<8x32xf32>
    %cst_90 = arith.constant dense<0.000000e+00> : vector<8xf32>
    %201 = vector.multi_reduction <add>, %200, %cst_90 [1] : vector<8x32xf32> to vector<8xf32>
    %202 = vector.shape_cast %201 : vector<8xf32> to vector<8x1xf32>
    %cst_91 = arith.constant 3.200000e+01 : f32
    %203 = vector.broadcast %cst_91 : f32 to vector<8x1xf32>
    %204 = arith.divf %202, %203 : vector<8x1xf32>
    %205 = vector.broadcast %197 : vector<8x1xf32> to vector<8x32xf32>
    %206 = arith.subf %193, %205 : vector<8x32xf32>
    %cst_92 = arith.constant 9.99999997E-7 : f32
    %207 = vector.broadcast %cst_92 : f32 to vector<8x1xf32>
    %208 = arith.addf %204, %207 : vector<8x1xf32>
    %209 = math.rsqrt %208 : vector<8x1xf32>
    %210 = vector.broadcast %209 : vector<8x1xf32> to vector<8x32xf32>
    %211 = arith.mulf %206, %210 : vector<8x32xf32>
    %c0_93 = arith.constant 0 : index
    %c0_94 = arith.constant 0 : index
    %c0_95 = arith.constant 0 : index
    %212 = vector.load %arg16[%c0_93, %c0_94, %c0_95] : memref<1x8x32xf32, #tpu.memory_space<vmem>>, vector<1x8x32xf32>
    %213 = vector.shape_cast %212 : vector<1x8x32xf32> to vector<8x32xf32>
    %214 = vector.shape_cast %211 : vector<8x32xf32> to vector<1x8x32xf32>
    tpu.vector_store %arg16[%c0_93, %c0_94, %c0_95], %214 {strides = array<i32>} : memref<1x8x32xf32, #tpu.memory_space<vmem>>, vector<1x8x32xf32>,
    return
  }
  func.func @transform_0(%arg0: i32, %arg1: i32) -> (i32, i32, i32) {
    %c0_i32 = arith.constant 0 : i32
    %c0_i32_0 = arith.constant 0 : i32
    return %arg0, %arg1, %c0_i32 : i32, i32, i32
  }
  func.func @transform_1(%arg0: i32, %arg1: i32) -> (i32, i32, i32) {
    %c0_i32 = arith.constant 0 : i32
    %c0_i32_0 = arith.constant 0 : i32
    %c0_i32_1 = arith.constant 0 : i32
    return %arg0, %c0_i32, %c0_i32_0 : i32, i32, i32
  }
  func.func @transform_2(%arg0: i32, %arg1: i32) -> (i32, i32) {
    %c0_i32 = arith.constant 0 : i32
    %c0_i32_0 = arith.constant 0 : i32
    %c0_i32_1 = arith.constant 0 : i32
    return %c0_i32, %c0_i32_0 : i32, i32
  }
  func.func @transform_3(%arg0: i32, %arg1: i32) -> (i32, i32) {
    %c0_i32 = arith.constant 0 : i32
    %c0_i32_0 = arith.constant 0 : i32
    %c0_i32_1 = arith.constant 0 : i32
    return %c0_i32, %c0_i32_0 : i32, i32
  }
  func.func @transform_4(%arg0: i32, %arg1: i32) -> (i32, i32) {
    %c0_i32 = arith.constant 0 : i32
    %c0_i32_0 = arith.constant 0 : i32
    %c0_i32_1 = arith.constant 0 : i32
    return %c0_i32, %c0_i32_0 : i32, i32
  }
  func.func @transform_5(%arg0: i32, %arg1: i32) -> (i32, i32) {
    %c0_i32 = arith.constant 0 : i32
    %c0_i32_0 = arith.constant 0 : i32
    %c0_i32_1 = arith.constant 0 : i32
    return %c0_i32, %c0_i32_0 : i32, i32
  }
  func.func @transform_6(%arg0: i32, %arg1: i32) -> (i32, i32) {
    %c0_i32 = arith.constant 0 : i32
    %c0_i32_0 = arith.constant 0 : i32
    %c0_i32_1 = arith.constant 0 : i32
    return %c0_i32, %c0_i32_0 : i32, i32
  }
  func.func @transform_7(%arg0: i32, %arg1: i32) -> (i32, i32) {
    %c0_i32 = arith.constant 0 : i32
    %c0_i32_0 = arith.constant 0 : i32
    %c0_i32_1 = arith.constant 0 : i32
    return %c0_i32, %c0_i32_0 : i32, i32
  }
  func.func @transform_8(%arg0: i32, %arg1: i32) -> (i32, i32) {
    %c0_i32 = arith.constant 0 : i32
    %c0_i32_0 = arith.constant 0 : i32
    %c0_i32_1 = arith.constant 0 : i32
    return %c0_i32, %c0_i32_0 : i32, i32
  }
  func.func @transform_9(%arg0: i32, %arg1: i32) -> (i32, i32) {
    %c0_i32 = arith.constant 0 : i32
    %c0_i32_0 = arith.constant 0 : i32
    %c0_i32_1 = arith.constant 0 : i32
    return %c0_i32, %c0_i32_0 : i32, i32
  }
  func.func @transform_10(%arg0: i32, %arg1: i32) -> (i32, i32) {
    %c0_i32 = arith.constant 0 : i32
    %c0_i32_0 = arith.constant 0 : i32
    %c0_i32_1 = arith.constant 0 : i32
    return %c0_i32, %c0_i32_0 : i32, i32
  }
  func.func @transform_11(%arg0: i32, %arg1: i32) -> (i32, i32) {
    %c0_i32 = arith.constant 0 : i32
    %c0_i32_0 = arith.constant 0 : i32
    %c0_i32_1 = arith.constant 0 : i32
    return %c0_i32, %c0_i32_0 : i32, i32
  }
  func.func @transform_12(%arg0: i32, %arg1: i32) -> (i32, i32) {
    %c0_i32 = arith.constant 0 : i32
    %c0_i32_0 = arith.constant 0 : i32
    %c0_i32_1 = arith.constant 0 : i32
    return %c0_i32, %c0_i32_0 : i32, i32
  }
  func.func @transform_13(%arg0: i32, %arg1: i32) -> (i32, i32) {
    %c0_i32 = arith.constant 0 : i32
    %c0_i32_0 = arith.constant 0 : i32
    %c0_i32_1 = arith.constant 0 : i32
    return %c0_i32, %c0_i32_0 : i32, i32
  }
  func.func @transform_14(%arg0: i32, %arg1: i32) -> (i32, i32, i32) {
    %c0_i32 = arith.constant 0 : i32
    %c0_i32_0 = arith.constant 0 : i32
    return %arg0, %arg1, %c0_i32 : i32, i32, i32
  }
}

</mosaic_0001>

<bundles_post_ra>
// kernel: tpu_custom_call.1
= control target key start
LH: loop header
LB: loop body
LE: loop exit
PB: predicated region body
PF: predicated region fallthrough
CT: control target
= control target key end

     0   :  { %s3655_s0 = inlined_call_operand.hbm [shape: f32[2,8,32], index: 0, kind: input, shape index: {}]   ;;  %s3656_s1 = inlined_call_operand.hbm [shape: bf16[2,8,32], index: 1, kind: input, shape index: {}]   ;;  %s3657_s2 = inlined_call_operand.hbm [shape: bf16[32,32], index: 2, kind: input, shape index: {}]   ;;  %s3658_s3 = inlined_call_operand.hbm [shape: bf16[32,32], index: 3, kind: input, shape index: {}]   ;;  %s3659_s4 = inlined_call_operand.hbm [shape: bf16[32,32], index: 4, kind: input, shape index: {}]   ;;  %s3660_s5 = inlined_call_operand.hbm [shape: f32[1,32], index: 5, kind: input, shape index: {}]   ;;  %s3661_s6 = inlined_call_operand.hbm [shape: f32[1,32], index: 6, kind: input, shape index: {}]   ;;  %s3662_s7 = inlined_call_operand.hbm [shape: f32[1,32], index: 7, kind: input, shape index: {}]   ;;  %s3663_s8 = inlined_call_operand.hbm [shape: bf16[32,32], index: 8, kind: input, shape index: {}]   ;;  %s3664_s9 = inlined_call_operand.hbm [shape: f32[1,32], index: 9, kind: input, shape index: {}]   ;;  %s3665_s10 = inlined_call_operand.hbm [shape: bf16[32,128], index: 10, kind: input, shape index: {}]   ;;  %s3666_s11 = inlined_call_operand.hbm [shape: f32[1,128], index: 11, kind: input, shape index: {}]   ;;  %s3667_s12 = inlined_call_operand.hbm [shape: bf16[128,32], index: 12, kind: input, shape index: {}]   ;;  %s3668_s13 = inlined_call_operand.hbm [shape: f32[1,32], index: 13, kind: input, shape index: {}]   ;;  %s3669_s14 = inlined_call_operand.hbm [shape: f32[2,8,32], index: 14, kind: output, shape index: {}]  }
   0x1   :  { %3684 = sst [smem:[#allocation44_spill]] %s3655_s0 }
   0x2   :  { %3685 = sst [smem:[#allocation45_spill]] %s3656_s1 }
   0x3   :  { %3686 = sst [smem:[#allocation46_spill]] %s3657_s2 }
   0x4   :  { %3687 = sst [smem:[#allocation47_spill]] %s3658_s3 }
   0x5   :  { %3688 = sst [smem:[#allocation48_spill]] %s3659_s4 }
   0x6   :  { %3689 = sst [smem:[#allocation49_spill]] %s3660_s5 }
   0x7   :  { %3690 = sst [smem:[#allocation50_spill]] %s3661_s6 }
   0x8   :  { %3691 = sst [smem:[#allocation51_spill]] %s3662_s7 }
   0x9   :  { %3692 = sst [smem:[#allocation52_spill]] %s3669_s14 }
   0xa   :  { %19 = vsyncpa [#allocation6], 0 }
   0xb   :  { %21 = vsyncpa [#allocation6 + $0x1], 0 }
   0xc   :  { %22 = vsyncpa [#allocation9], 0 }
   0xd   :  { %24 = vsyncpa [#allocation9 + $0x1], 0 }
   0xe   :  { %25 = vsyncpa [#allocation12], 0 }
   0xf   :  { %26 = vsyncpa [#allocation15], 0 }
  0x10   :  { %27 = vsyncpa [#allocation18], 0 }
  0x11   :  { %28 = vsyncpa [#allocation21], 0 }
  0x12   :  { %29 = vsyncpa [#allocation24], 0 }
  0x13   :  { %30 = vsyncpa [#allocation27], 0 }
  0x14   :  { %31 = vsyncpa [#allocation7], 0 }
  0x15   :  { %33 = vsyncpa [#allocation7 + $0x1], 0  ;;  %s3032_s29 = smov 0   ;;  %s3034_s30 = smov 0  }
  0x16   :  { %s3036_s15 = smov 0   ;;  %s3038_s16 = smov 0  }
  0x17   :  { %s3040_s17 = smov 0   ;;  %s3042_s18 = smov 0  }
  0x18 LB: > { %3693 = sst [smem:[#allocation39_spill]] %s2910_s29  ;;  %s3063_s19 = sadd.s32 4294967295, %s2930_s18   ;;  %s2930_s18 = sphi %s3042_s18, %s39_s18   ;;  %s2926_s17 = sphi %s3040_s17, %s3749_s17   ;;  %s2922_s16 = sphi %s3038_s16, %s3748_s16   ;;  %s2918_s15 = sphi %s3036_s15, %s3747_s15   ;;  %s2914_s30 = sphi %s3034_s30, %s3746_s30   ;;  %s2910_s29 = sphi %s3032_s29, %s3745_s29  }
  0x19   : > { %3694 = sst [smem:[#allocation40_spill]] %s2914_s30  ;;  %p1939_p0 = scmp.ge.s32.totalorder %s2930_s18, 1 }
  0x1a   : > { %3695 = sst [smem:[#allocation41_spill]] %s2922_s16  ;;  %p3678_p1 = scmp.eq.s32.totalorder %s3063_s19, 0 }
  0x1b   : > { %3696 = sst [smem:[#allocation42_spill]] %s3063_s19  ;;  %p390_p2 = scmp.lt.s32.totalorder %s2930_s18, 3 }
  0x1c   : > { %s2932_s21 = smov [#allocation10]   ;;  %s2933_s24 = smov [#allocation11]  }
  0x1d   : > { %p3068_p3 = pnand %p1939_p0, %p390_p2  ;;  %s402_s22 = sshll.u32 %s2932_s21, 4  ;;  %s3072_s22 = int_to_ptr.vmem [resolvable:$true] %s402_s22 }
  0x1e   : > { %s415_s25 = sshll.u32 %s2933_s24, 4  ;;  %s2934_s26 = smov [#allocation14]   ;;  %s3083_s25 = int_to_ptr.vmem [resolvable:$true] %s415_s25 }
  0x1f   : > { %s3697_s20 = scalar_select %p3068_p3, 1, 0 }
  0x20   : > { %p2222_p4 = pneg %p3068_p3  ;;  %s3085_s27 = sshll.u32 %s2934_s26, 4  ;;  %s443_s27 = int_to_ptr.vmem [resolvable:$true] %s3085_s27 }
  0x21   : > { %3698 = sst [smem:[#allocation43_spill]] %s3697_s20  ;;  %s3700_s2 = sld [smem:[#allocation46_spill]] }
  0x22   : > { %p3079_p6 = pnand %p2222_p4, %p3678_p1 }
  0x24   : > { %p3095_p8 = pneg %p3079_p6 }
  0x27   : > { %s2420_s14 = scalar_lea.hbm %s3700_s2, 256 }
  0x28   : > { %p2421_p7 = scmp.ne.s32.totalorder %s3700_s2, %s2420_s14  ;;  %p2427_p11 = scmp.lt.u32.totalorder %s2420_s14, %s3700_s2 }
  0x2a   : > { %p2423_p9 = pnand %p3095_p8, %p2421_p7 }
  0x2c   : > { %p2424_p10 = pneg %p2423_p9 }
  0x2e   : > { %p2429_p12 = pnand %p2427_p11, %p2424_p10 }
  0x30   : > { %2432 = shalt.err (!%p2429_p12)
}
  0x31   : > { %s2433_s16 = scalar_lea.vmem %s3072_s22, 256  ;;  %p2441_p4 = scmp.lt.s32.totalorder %s3072_s22, %s3072_s22 }
  0x32   : > { %p2434_p13 = scmp.ne.s32.totalorder %s3072_s22, %s2433_s16  ;;  %p2442_p5 = scmp.lt.s32.totalorder %s2433_s16, %s2433_s16 }
  0x34   : > { %p2436_p0 = pnand %p2434_p13, %p3095_p8  ;;  %p2443_p7 = por %p2442_p5, %p2441_p4 }
  0x36   : > { %p2437_p2 = pneg %p2436_p0 }
  0x38   : > { %p2444_p9 = pnand %p2443_p7, %p2437_p2 }
  0x3a   : > { %2447 = shalt.err (!%p2444_p9)
}
  0x3b   : > { %s3680_s20 = smov 64   ;;  %s2936_s14 = smov 4  }
  0x3c   : > { %2225 = dma.hbm_to_vmem [thread:$0]  (!%p3079_p6), %s3700_s2, 256, %s3072_s22, [#allocation9], %s3680_s20, %s3680_s20, %s2936_s14  }
  0x3d   : > { %s3702_s3 = sld [smem:[#allocation47_spill]] }
  0x43   : > { %s2448_s16 = scalar_lea.hbm %s3702_s3, 256 }
  0x44   : > { %p2449_p5 = scmp.ne.s32.totalorder %s3702_s3, %s2448_s16  ;;  %p2455_p12 = scmp.lt.u32.totalorder %s2448_s16, %s3702_s3 }
  0x46   : > { %p2451_p10 = pnand %p2449_p5, %p3095_p8 }
  0x48   : > { %p2452_p11 = pneg %p2451_p10 }
  0x4a   : > { %p2457_p13 = pnand %p2455_p12, %p2452_p11 }
  0x4c   : > { %2460 = shalt.err (!%p2457_p13)
}
  0x4d   : > { %s2461_s22 = scalar_lea.vmem %s3083_s25, 256  ;;  %p2469_p7 = scmp.lt.s32.totalorder %s3083_s25, %s3083_s25 }
  0x4e   : > { %p2462_p0 = scmp.ne.s32.totalorder %s3083_s25, %s2461_s22  ;;  %p2470_p9 = scmp.lt.s32.totalorder %s2461_s22, %s2461_s22 }
  0x50   : > { %p2464_p2 = pnand %p2462_p0, %p3095_p8  ;;  %p2471_p5 = por %p2470_p9, %p2469_p7 }
  0x52   : > { %p2465_p4 = pneg %p2464_p2 }
  0x54   : > { %p2472_p10 = pnand %p2471_p5, %p2465_p4 }
  0x56   : > { %2475 = shalt.err (!%p2472_p10)
}
  0x57   : > { %2228 = dma.hbm_to_vmem [thread:$0]  (!%p3079_p6), %s3702_s3, 256, %s3083_s25, [#allocation12], %s3680_s20, %s3680_s20, %s2936_s14  }
  0x58   : > { %s3703_s5 = sld [smem:[#allocation49_spill]] }
  0x5e   : > { %s2476_s28 = scalar_lea.hbm %s3703_s5, 16 }
  0x5f   : > { %p2477_p11 = scmp.ne.s32.totalorder %s3703_s5, %s2476_s28  ;;  %p2483_p0 = scmp.lt.u32.totalorder %s2476_s28, %s3703_s5 }
  0x61   : > { %p2479_p12 = pnand %p2477_p11, %p3095_p8 }
  0x63   : > { %p2480_p13 = pneg %p2479_p12 }
  0x65   : > { %p2485_p2 = pnand %p2483_p0, %p2480_p13 }
  0x67   : > { %2488 = shalt.err (!%p2485_p2)
}
  0x68   : > { %s2489_s22 = scalar_lea.vmem %s443_s27, 16  ;;  %s2496_s25 = scalar_lea.vmem %s443_s27, 32 }
  0x69   : > { %p2490_p4 = scmp.ne.s32.totalorder %s443_s27, %s2489_s22  ;;  %p2497_p5 = scmp.lt.s32.totalorder %s443_s27, %s443_s27 }
  0x6a   : > { %p2498_p10 = scmp.lt.s32.totalorder %s2496_s25, %s2489_s22 }
  0x6b   : > { %p2492_p7 = pnand %p2490_p4, %p3095_p8 }
  0x6c   : > { %p2499_p1 = por %p2498_p10, %p2497_p5 }
  0x6d   : > { %p2493_p9 = pneg %p2492_p7 }
  0x6f   : > { %p2500_p3 = pnand %p2499_p1, %p2493_p9 }
  0x71   : > { %2503 = shalt.err (!%p2500_p3)
}
  0x72   : > { %2234 = dma.hbm_to_vmem [thread:$0]  (!%p3079_p6), %s3703_s5, 16, %s443_s27, [#allocation15]  }
  0x73   : > { %s2937_s30 = smov [#allocation17]   ;;  %s2938_s28 = smov [#allocation20]  }
  0x74   : > { %s464_s19 = sshll.u32 %s2937_s30, 4  ;;  %s488_s21 = sshll.u32 %s2938_s28, 4  ;;  %s465_s19 = int_to_ptr.vmem [resolvable:$true] %s464_s19  ;;  %s489_s21 = int_to_ptr.vmem [resolvable:$true] %s488_s21 }
  0x75   : > { %s3704_s7 = sld [smem:[#allocation51_spill]] }
  0x7b   : > { %s2504_s16 = scalar_lea.hbm %s3704_s7, 16 }
  0x7c   : > { %p2505_p1 = scmp.ne.s32.totalorder %s3704_s7, %s2504_s16  ;;  %p2511_p12 = scmp.lt.u32.totalorder %s2504_s16, %s3704_s7 }
  0x7e   : > { %p2507_p3 = pnand %p2505_p1, %p3095_p8 }
  0x80   : > { %p2508_p11 = pneg %p2507_p3 }
  0x82   : > { %p2513_p13 = pnand %p2511_p12, %p2508_p11 }
  0x84   : > { %2516 = shalt.err (!%p2513_p13)
}
  0x85   : > { %s2517_s27 = scalar_lea.vmem %s465_s19, 16  ;;  %s2524_s29 = scalar_lea.vmem %s465_s19, 32 }
  0x86   : > { %p2518_p0 = scmp.ne.s32.totalorder %s465_s19, %s2517_s27  ;;  %p2525_p7 = scmp.lt.s32.totalorder %s465_s19, %s465_s19 }
  0x87   : > { %p2526_p9 = scmp.lt.s32.totalorder %s2524_s29, %s2517_s27 }
  0x88   : > { %p2520_p2 = pnand %p2518_p0, %p3095_p8 }
  0x89   : > { %p2527_p5 = por %p2526_p9, %p2525_p7 }
  0x8a   : > { %p2521_p4 = pneg %p2520_p2 }
  0x8c   : > { %p2528_p10 = pnand %p2527_p5, %p2521_p4 }
  0x8e   : > { %2531 = shalt.err (!%p2528_p10)
}
  0x8f   : > { %2240 = dma.hbm_to_vmem [thread:$0]  (!%p3079_p6), %s3704_s7, 16, %s465_s19, [#allocation18]  }
  0x90   : > { %s2532_s26 = scalar_lea.hbm %s3664_s9, 16 }
  0x91   : > { %p2533_p1 = scmp.ne.s32.totalorder %s3664_s9, %s2532_s26  ;;  %p2539_p12 = scmp.lt.u32.totalorder %s2532_s26, %s3664_s9 }
  0x93   : > { %p2535_p3 = pnand %p2533_p1, %p3095_p8 }
  0x95   : > { %p2536_p11 = pneg %p2535_p3 }
  0x97   : > { %p2541_p13 = pnand %p2539_p12, %p2536_p11 }
  0x99   : > { %2544 = shalt.err (!%p2541_p13)
}
  0x9a   : > { %s2545_s27 = scalar_lea.vmem %s489_s21, 16  ;;  %s2552_s19 = scalar_lea.vmem %s489_s21, 32 }
  0x9b   : > { %p2546_p0 = scmp.ne.s32.totalorder %s489_s21, %s2545_s27  ;;  %p2553_p7 = scmp.lt.s32.totalorder %s489_s21, %s489_s21 }
  0x9c   : > { %p2554_p9 = scmp.lt.s32.totalorder %s2552_s19, %s2545_s27 }
  0x9d   : > { %p2548_p2 = pnand %p2546_p0, %p3095_p8 }
  0x9e   : > { %p2555_p5 = por %p2554_p9, %p2553_p7 }
  0x9f   : > { %p2549_p4 = pneg %p2548_p2 }
  0xa1   : > { %p2556_p10 = pnand %p2555_p5, %p2549_p4 }
  0xa3   : > { %2559 = shalt.err (!%p2556_p10)
}
  0xa4   : > { %2246 = dma.hbm_to_vmem [thread:$0]  (!%p3079_p6), %s3664_s9, 16, %s489_s21, [#allocation21]  }
  0xa5   : > { %s2939_s28 = smov [#allocation23]   ;;  %s2940_s24 = smov [#allocation13]  }
  0xa6   : > { %s512_s20 = sshll.u32 %s2939_s28, 4  ;;  %s428_s26 = sshll.u32 %s2940_s24, 4  ;;  %s513_s20 = int_to_ptr.vmem [resolvable:$true] %s512_s20  ;;  %s429_s26 = int_to_ptr.vmem [resolvable:$true] %s428_s26 }
  0xa7   : > { %s2560_s25 = scalar_lea.hbm %s3666_s11, 16 }
  0xa8   : > { %p2561_p1 = scmp.ne.s32.totalorder %s3666_s11, %s2560_s25  ;;  %p2567_p12 = scmp.lt.u32.totalorder %s2560_s25, %s3666_s11 }
  0xaa   : > { %p2563_p3 = pnand %p2561_p1, %p3095_p8 }
  0xac   : > { %p2564_p11 = pneg %p2563_p3 }
  0xae   : > { %p2569_p13 = pnand %p2567_p12, %p2564_p11 }
  0xb0   : > { %2572 = shalt.err (!%p2569_p13)
}
  0xb1   : > { %s2573_s21 = scalar_lea.vmem %s513_s20, 16  ;;  %s2580_s30 = scalar_lea.vmem %s513_s20, 32 }
  0xb2   : > { %p2574_p0 = scmp.ne.s32.totalorder %s513_s20, %s2573_s21  ;;  %p2581_p7 = scmp.lt.s32.totalorder %s513_s20, %s513_s20 }
  0xb3   : > { %p2582_p9 = scmp.lt.s32.totalorder %s2580_s30, %s2573_s21 }
  0xb4   : > { %p2576_p2 = pnand %p2574_p0, %p3095_p8 }
  0xb5   : > { %p2583_p5 = por %p2582_p9, %p2581_p7 }
  0xb6   : > { %p2577_p4 = pneg %p2576_p2 }
  0xb8   : > { %p2584_p10 = pnand %p2583_p5, %p2577_p4 }
  0xba   : > { %2587 = shalt.err (!%p2584_p10)
}
  0xbb   : > { %2252 = dma.hbm_to_vmem [thread:$0]  (!%p3079_p6), %s3666_s11, 16, %s513_s20, [#allocation24]  }
  0xbc   : > { %s3705_s4 = sld [smem:[#allocation48_spill]] }
  0xc2   : > { %s2588_s25 = scalar_lea.hbm %s3705_s4, 256 }
  0xc3   : > { %p2589_p1 = scmp.ne.s32.totalorder %s3705_s4, %s2588_s25  ;;  %p2595_p12 = scmp.lt.u32.totalorder %s2588_s25, %s3705_s4 }
  0xc5   : > { %p2591_p3 = pnand %p2589_p1, %p3095_p8 }
  0xc7   : > { %p2592_p11 = pneg %p2591_p3 }
  0xc9   : > { %p2597_p13 = pnand %p2595_p12, %p2592_p11 }
  0xcb   : > { %2600 = shalt.err (!%p2597_p13)
}
  0xcc   : > { %s2601_s21 = scalar_lea.vmem %s429_s26, 256  ;;  %p2609_p7 = scmp.lt.s32.totalorder %s429_s26, %s429_s26 }
  0xcd   : > { %p2602_p0 = scmp.ne.s32.totalorder %s429_s26, %s2601_s21  ;;  %p2610_p9 = scmp.lt.s32.totalorder %s2601_s21, %s2601_s21 }
  0xcf   : > { %p2604_p2 = pnand %p2602_p0, %p3095_p8  ;;  %p2611_p5 = por %p2610_p9, %p2609_p7 }
  0xd1   : > { %p2605_p4 = pneg %p2604_p2 }
  0xd3   : > { %p2612_p10 = pnand %p2611_p5, %p2605_p4 }
  0xd5   : > { %2615 = shalt.err (!%p2612_p10)
}
  0xd6   : > { %s3706_s20 = smov 64   ;;  %s2941_s24 = smov [#allocation16]  }
  0xd7   : > { %2231 = dma.hbm_to_vmem [thread:$0]  (!%p3079_p6), %s3705_s4, 256, %s429_s26, [#allocation12], %s3706_s20, %s3706_s20, %s2936_s14  }
  0xd8   : > { %s453_s16 = sshll.u32 %s2941_s24, 4  ;;  %s2942_s22 = smov [#allocation19]   ;;  %s454_s16 = int_to_ptr.vmem [resolvable:$true] %s453_s16 }
  0xd9   : > { %s474_s25 = sshll.u32 %s2942_s22, 4  ;;  %s3707_s6 = sld [smem:[#allocation50_spill]]  ;;  %s475_s25 = int_to_ptr.vmem [resolvable:$true] %s474_s25 }
  0xdf   : > { %s2616_s19 = scalar_lea.hbm %s3707_s6, 16 }
  0xe0   : > { %p2617_p1 = scmp.ne.s32.totalorder %s3707_s6, %s2616_s19  ;;  %p2623_p12 = scmp.lt.u32.totalorder %s2616_s19, %s3707_s6 }
  0xe2   : > { %p2619_p3 = pnand %p2617_p1, %p3095_p8 }
  0xe4   : > { %p2620_p11 = pneg %p2619_p3 }
  0xe6   : > { %p2625_p13 = pnand %p2623_p12, %p2620_p11 }
  0xe8   : > { %2628 = shalt.err (!%p2625_p13)
}
  0xe9   : > { %s2629_s26 = scalar_lea.vmem %s454_s16, 16  ;;  %s2636_s28 = scalar_lea.vmem %s454_s16, 32 }
  0xea   : > { %p2630_p0 = scmp.ne.s32.totalorder %s454_s16, %s2629_s26  ;;  %p2637_p7 = scmp.lt.s32.totalorder %s454_s16, %s454_s16 }
  0xeb   : > { %p2638_p9 = scmp.lt.s32.totalorder %s2636_s28, %s2629_s26 }
  0xec   : > { %p2632_p2 = pnand %p2630_p0, %p3095_p8 }
  0xed   : > { %p2639_p5 = por %p2638_p9, %p2637_p7 }
  0xee   : > { %p2633_p4 = pneg %p2632_p2 }
  0xf0   : > { %p2640_p10 = pnand %p2639_p5, %p2633_p4 }
  0xf2   : > { %2643 = shalt.err (!%p2640_p10)
}
  0xf3   : > { %2237 = dma.hbm_to_vmem [thread:$0]  (!%p3079_p6), %s3707_s6, 16, %s454_s16, [#allocation15]  }
  0xf4   : > { %s2644_s27 = scalar_lea.hbm %s3663_s8, 256 }
  0xf5   : > { %p2645_p1 = scmp.ne.s32.totalorder %s3663_s8, %s2644_s27  ;;  %p2651_p12 = scmp.lt.u32.totalorder %s2644_s27, %s3663_s8 }
  0xf7   : > { %p2647_p3 = pnand %p2645_p1, %p3095_p8 }
  0xf9   : > { %p2648_p11 = pneg %p2647_p3 }
  0xfb   : > { %p2653_p13 = pnand %p2651_p12, %p2648_p11 }
  0xfd   : > { %2656 = shalt.err (!%p2653_p13)
}
  0xfe   : > { %s2657_s26 = scalar_lea.vmem %s475_s25, 256  ;;  %p2665_p7 = scmp.lt.s32.totalorder %s475_s25, %s475_s25 }
  0xff   : > { %p2658_p0 = scmp.ne.s32.totalorder %s475_s25, %s2657_s26  ;;  %p2666_p9 = scmp.lt.s32.totalorder %s2657_s26, %s2657_s26 }
 0x101   : > { %p2660_p2 = pnand %p2658_p0, %p3095_p8  ;;  %p2667_p5 = por %p2666_p9, %p2665_p7 }
 0x103   : > { %p2661_p4 = pneg %p2660_p2 }
 0x105   : > { %p2668_p10 = pnand %p2667_p5, %p2661_p4 }
 0x107   : > { %2671 = shalt.err (!%p2668_p10)
}
 0x108   : > { %2243 = dma.hbm_to_vmem [thread:$0]  (!%p3079_p6), %s3663_s8, 256, %s475_s25, [#allocation18], %s3706_s20, %s3706_s20, %s2936_s14  }
 0x109   : > { %s2943_s24 = smov [#allocation22]   ;;  %s2944_s2 = smov [#allocation25]  }
 0x10a   : > { %s498_s22 = sshll.u32 %s2943_s24, 4  ;;  %s522_s0 = sshll.u32 %s2944_s2, 4  ;;  %s499_s22 = int_to_ptr.vmem [resolvable:$true] %s498_s22  ;;  %s523_s0 = int_to_ptr.vmem [resolvable:$true] %s522_s0 }
 0x10b   : > { %s2672_s29 = scalar_lea.hbm %s3665_s10, 256 }
 0x10c   : > { %p2673_p1 = scmp.ne.s32.totalorder %s3665_s10, %s2672_s29  ;;  %p2679_p12 = scmp.lt.u32.totalorder %s2672_s29, %s3665_s10 }
 0x10e   : > { %p2675_p3 = pnand %p2673_p1, %p3095_p8 }
 0x110   : > { %p2676_p11 = pneg %p2675_p3 }
 0x112   : > { %p2681_p13 = pnand %p2679_p12, %p2676_p11 }
 0x114   : > { %2684 = shalt.err (!%p2681_p13)
}
 0x115   : > { %s2685_s25 = scalar_lea.vmem %s499_s22, 256  ;;  %p2693_p7 = scmp.lt.s32.totalorder %s499_s22, %s499_s22 }
 0x116   : > { %p2686_p0 = scmp.ne.s32.totalorder %s499_s22, %s2685_s25  ;;  %p2694_p9 = scmp.lt.s32.totalorder %s2685_s25, %s2685_s25 }
 0x118   : > { %p2688_p2 = pnand %p2686_p0, %p3095_p8  ;;  %p2695_p5 = por %p2694_p9, %p2693_p7 }
 0x11a   : > { %p2689_p4 = pneg %p2688_p2 }
 0x11c   : > { %p2696_p10 = pnand %p2695_p5, %p2689_p4 }
 0x11e   : > { %2699 = shalt.err (!%p2696_p10)
}
 0x11f   : > { %2249 = dma.hbm_to_vmem [thread:$0]  (!%p3079_p6), %s3665_s10, 256, %s499_s22, [#allocation21], %s3706_s20, %s3706_s20, %s2936_s14  }
 0x120   : > { %s2700_s19 = scalar_lea.hbm %s3667_s12, 1024 }
 0x121   : > { %p2701_p1 = scmp.ne.s32.totalorder %s3667_s12, %s2700_s19  ;;  %p2707_p12 = scmp.lt.u32.totalorder %s2700_s19, %s3667_s12 }
 0x123   : > { %p2703_p3 = pnand %p2701_p1, %p3095_p8 }
 0x125   : > { %p2704_p11 = pneg %p2703_p3 }
 0x127   : > { %p2709_p13 = pnand %p2707_p12, %p2704_p11 }
 0x129   : > { %2712 = shalt.err (!%p2709_p13)
}
 0x12a   : > { %s2713_s16 = scalar_lea.vmem %s523_s0, 1024  ;;  %p2721_p7 = scmp.lt.s32.totalorder %s523_s0, %s523_s0 }
 0x12b   : > { %p2714_p0 = scmp.ne.s32.totalorder %s523_s0, %s2713_s16  ;;  %p2722_p9 = scmp.lt.s32.totalorder %s2713_s16, %s2713_s16 }
 0x12d   : > { %p2716_p2 = pnand %p2714_p0, %p3095_p8  ;;  %p2723_p5 = por %p2722_p9, %p2721_p7 }
 0x12f   : > { %p2717_p4 = pneg %p2716_p2 }
 0x131   : > { %p2724_p10 = pnand %p2723_p5, %p2717_p4 }
 0x133   : > { %2727 = shalt.err (!%p2724_p10)
}
 0x134   : > { %2255 = dma.hbm_to_vmem [thread:$0]  (!%p3079_p6), %s3667_s12, 1024, %s523_s0, [#allocation24], %s3706_s20, %s3706_s20, %s2936_s14  }
 0x135   : > { %s2945_s28 = smov [#allocation26]   ;;  %s2728_s19 = scalar_lea.hbm %s3668_s13, 16 }
 0x136   : > { %s536_s24 = sshll.u32 %s2945_s28, 4  ;;  %p2729_p1 = scmp.ne.s32.totalorder %s3668_s13, %s2728_s19  ;;  %s537_s24 = int_to_ptr.vmem [resolvable:$true] %s536_s24 }
 0x137   : > { %p2735_p12 = scmp.lt.u32.totalorder %s2728_s19, %s3668_s13 }
 0x138   : > { %p2731_p3 = pnand %p2729_p1, %p3095_p8 }
 0x13a   : > { %p2732_p11 = pneg %p2731_p3 }
 0x13c   : > { %p2737_p13 = pnand %p2735_p12, %p2732_p11 }
 0x13e   : > { %2740 = shalt.err (!%p2737_p13)
}
 0x13f   : > { %s2741_s14 = scalar_lea.vmem %s537_s24, 16  ;;  %s2748_s20 = scalar_lea.vmem %s537_s24, 32 }
 0x140   : > { %p2742_p0 = scmp.ne.s32.totalorder %s537_s24, %s2741_s14  ;;  %p2749_p7 = scmp.lt.s32.totalorder %s537_s24, %s537_s24 }
 0x141   : > { %p2750_p9 = scmp.lt.s32.totalorder %s2748_s20, %s2741_s14 }
 0x142   : > { %p2744_p2 = pnand %p2742_p0, %p3095_p8 }
 0x143   : > { %p2751_p5 = por %p2750_p9, %p2749_p7 }
 0x144   : > { %p2745_p4 = pneg %p2744_p2 }
 0x146   : > { %p2752_p10 = pnand %p2751_p5, %p2745_p4 }
 0x148   : > { %2755 = shalt.err (!%p2752_p10)
}
 0x149   : > { %s3708_s22 = sld [smem:[#allocation40_spill]]  ;;  %s3709_s1 = sld [smem:[#allocation39_spill]] }
 0x14a   : > { %s3710_s25 = sld [smem:[#allocation42_spill]]  ;;  %s1938_s28 = sadd.s32 4294967294, %s2930_s18  }
 0x14b   : > { %2258 = dma.hbm_to_vmem [thread:$0]  (!%p3079_p6), %s3668_s13, 16, %s537_s24, [#allocation27]  }
 0x14c   : > { %s51_s2 = sadd.s32 1, %s2926_s17  ;;  %s60_s23 = sadd.s32 1, %s2918_s15 }
 0x14d   : > { %p53_p8 = scmp.ge.s32.totalorder %s51_s2, 2  ;;  %p68_p3 = scmp.eq.s32.totalorder %s2930_s18, 0 }
 0x14e   : > { %p383_p7 = scmp.eq.s32.totalorder %s1938_s28, 1  ;;  %p2282_p5 = scmp.lt.s32.totalorder %s2930_s18, 2 }
 0x14f   : > { %p67_p1 = scmp.ne.s32.totalorder %s2918_s15, %s3708_s22  ;;  %s3751_s2 = smov (%p53_p8, %s51_s2), 0 }
 0x150   : > { %p73_p12 = scmp.ne.s32.totalorder %s3708_s22, %s3709_s1  ;;  %s55_s24 = ssub.s32 %s2926_s17, %s3751_s2 }
 0x151   : > { %p3346_p11 = por %p68_p3, %p67_p1  ;;  %p377_p6 = scmp.eq.s32.totalorder %s3710_s25, 1 }
 0x152   : > { %p58_p13 = scmp.eq.s32.totalorder %s55_s24, 0  ;;  %p3712_p0 = scmp.eq.s32.totalorder %s3710_s25, 0 }
 0x153   : > { %p3361_p4 = por %p377_p6, %p67_p1  ;;  %p3368_p9 = por %p383_p7, %p73_p12 }
 0x154   : > { %p3357_p2 = por %p3712_p0, %p73_p12  ;;  %s3374_s26 = sand.u32 1, %s2918_s15  }
 0x155   : > { %s3714_s29 = scalar_select %p3361_p4, 1, 0 }
 0x156   : > { %s3713_s19 = scalar_select %p3357_p2, 1, 0 }
 0x157   : > { %s3366_s21 = scalar_select %p58_p13, %s2918_s15, %s60_s23  }
 0x158   : > { %s3715_s30 = scalar_select %p3368_p9, 1, 0 }
 0x159   : > { %s1954_s14 = sshll.u32 %s2926_s17, 7  ;;  %s1953_s20 = sshll.u32 %s3374_s26, 3 }
 0x15a   : > { %s3716_s22 = sld [smem:[#allocation44_spill]]  ;;  %s551_s25 = scalar_lea.vmem [#allocation5], %s1953_s20 }
 0x15b   : > { %s559_s28 = sshll.u32 %s551_s25, 4  ;;  %p3385_p10 = pnand %p2282_p5, %p3346_p11  ;;  %s3389_s28 = int_to_ptr.vmem [resolvable:$true] %s559_s28 }
 0x15c   : > { %s548_s3 = scalar_lea.sflag [#allocation6], %s3374_s26 }
 0x15d   : > { %p2758_p1 = pneg %p3385_p10 }
 0x160   : > { %s3381_s1 = scalar_lea.hbm %s3716_s22, %s1954_s14  ;;  %s2761_s20 = scalar_lea.hbm %s3716_s22, 256 }
 0x161   : > { %s2756_s0 = scalar_lea.hbm %s3381_s1, 128  ;;  %p2762_p11 = scmp.lt.u32.totalorder %s3381_s1, %s3716_s22 }
 0x162   : > { %p2757_p8 = scmp.ne.s32.totalorder %s3381_s1, %s2756_s0  ;;  %p2763_p6 = scmp.lt.u32.totalorder %s2761_s20, %s2756_s0 }
 0x163   : > { %p2765_p0 = scmp.lt.u32.totalorder %s2756_s0, %s3381_s1 }
 0x164   : > { %p2759_p3 = pnand %p2758_p1, %p2757_p8  ;;  %p2764_p13 = por %p2763_p6, %p2762_p11 }
 0x166   : > { %p2760_p12 = pneg %p2759_p3  ;;  %p2766_p7 = por %p2765_p0, %p2764_p13 }
 0x168   : > { %p2767_p5 = pnand %p2766_p7, %p2760_p12 }
 0x16a   : > { %2770 = shalt.err (!%p2767_p5)
}
 0x16b   : > { %s2771_s24 = scalar_lea.vmem %s3389_s28, 128  ;;  %s2946_s14 = smov [#allocation5]  }
 0x16c   : > { %p2772_p8 = scmp.ne.s32.totalorder %s3389_s28, %s2771_s24  ;;  %s2776_s27 = sshll.u32 %s2946_s14, 4  ;;  %s2777_s27 = int_to_ptr.vmem [resolvable:$false] %s2776_s27 }
 0x16d   : > { %s2778_s16 = scalar_lea.vmem %s2777_s27, 256  ;;  %p2779_p4 = scmp.lt.s32.totalorder %s3389_s28, %s2777_s27 }
 0x16e   : > { %p2774_p3 = pnand %p2772_p8, %p2758_p1  ;;  %p2780_p11 = scmp.lt.s32.totalorder %s2778_s16, %s2771_s24 }
 0x170   : > { %p2775_p9 = pneg %p2774_p3  ;;  %p2781_p6 = por %p2780_p11, %p2779_p4 }
 0x172   : > { %p2782_p13 = pnand %p2781_p6, %p2775_p9 }
 0x174   : > { %2785 = shalt.err (!%p2782_p13)
}
 0x175   : > { %2262 = dma.hbm_to_vmem [thread:$0]  (!%p3385_p10), %s3381_s1, 128, %s3389_s28, %s548_s3  }
 0x176   : > { %s1955_s0 = sshll.u32 %s3374_s26, 2  ;;  %s1956_s20 = sshll.u32 %s2926_s17, 6 }
 0x177   : > { %s3718_s4 = sld [smem:[#allocation45_spill]]  ;;  %s570_s24 = scalar_lea.vmem [#allocation8], %s1955_s0 }
 0x178   : > { %s577_s27 = sshll.u32 %s570_s24, 4  ;;  %s3719_s16 = sand.u32 1, %s2930_s18   ;;  %s578_s27 = int_to_ptr.vmem [resolvable:$true] %s577_s27 }
 0x179   : > { %s567_s6 = scalar_lea.sflag [#allocation9], %s3719_s16 }
 0x17d   : > { %s3423_s5 = scalar_lea.hbm %s3718_s4, %s1956_s20  ;;  %s2791_s1 = scalar_lea.hbm %s3718_s4, 128 }
 0x17e   : > { %s2786_s7 = scalar_lea.hbm %s3423_s5, 64  ;;  %p2792_p0 = scmp.lt.u32.totalorder %s3423_s5, %s3718_s4 }
 0x17f   : > { %p2787_p4 = scmp.ne.s32.totalorder %s3423_s5, %s2786_s7  ;;  %p2793_p7 = scmp.lt.u32.totalorder %s2791_s1, %s2786_s7 }
 0x180   : > { %p2795_p8 = scmp.lt.u32.totalorder %s2786_s7, %s3423_s5 }
 0x181   : > { %p2789_p9 = pnand %p2787_p4, %p2758_p1  ;;  %p2794_p5 = por %p2793_p7, %p2792_p0 }
 0x183   : > { %p2790_p12 = pneg %p2789_p9  ;;  %p2796_p3 = por %p2795_p8, %p2794_p5 }
 0x185   : > { %p2797_p11 = pnand %p2796_p3, %p2790_p12 }
 0x187   : > { %2800 = shalt.err (!%p2797_p11)
}
 0x188   : > { %s2801_s0 = scalar_lea.vmem %s578_s27, 64  ;;  %s2947_s25 = smov [#allocation8]  }
 0x189   : > { %p2802_p6 = scmp.ne.s32.totalorder %s578_s27, %s2801_s0  ;;  %s2806_s14 = sshll.u32 %s2947_s25, 4  ;;  %s2807_s14 = int_to_ptr.vmem [resolvable:$false] %s2806_s14 }
 0x18a   : > { %s2808_s24 = scalar_lea.vmem %s2807_s14, 128  ;;  %p2809_p9 = scmp.lt.s32.totalorder %s578_s27, %s2807_s14 }
 0x18b   : > { %p2804_p13 = pnand %p2802_p6, %p2758_p1  ;;  %p2810_p2 = scmp.lt.s32.totalorder %s2808_s24, %s2801_s0 }
 0x18d   : > { %p2805_p4 = pneg %p2804_p13  ;;  %p2811_p0 = por %p2810_p2, %p2809_p9 }
 0x18f   : > { %p2812_p7 = pnand %p2811_p0, %p2805_p4 }
 0x191   : > { %2815 = shalt.err (!%p2812_p7)
}
 0x192   : > { %2265 = dma.hbm_to_vmem [thread:$0]  (!%p3385_p10), %s3423_s5, 64, %s578_s27, %s567_s6  }
 0x193   : > { %s3720_s7 = sld [smem:[#allocation43_spill]] }
 0x199   : > { %p3721_p12 = scmp.ne.s32.totalorder %s3720_s7, 0 }
 0x19a   : > { %s3722_s16 = sld [smem:[#allocation40_spill]] (!%p3721_p12)  ;;  %p3723_p2 = scmp.ne.s32.totalorder (!%p3721_p12), %s3713_s19, 0 }
 0x19b   : > { %586 = sbr.rel (%p3721_p12) target bundleno = 2854 (0xb26), region = 76 }
 0x1a0   : > { %s3449_s3 = sand.u32 (!%p3721_p12), 1, %s3722_s16  }
 0x1a1   : > { %s1958_s26 = sshll.u32 (!%p3721_p12), %s3449_s3, 3  ;;  %s589_s1 = scalar_lea.sflag (!%p3721_p12), [#allocation6], %s3449_s3 }
 0x1a2   : > { %s3455_s28 = scalar_lea.vmem [#allocation5], %s1958_s26 }
 0x1a3   : > { %2869 = dma.done.wait (%p3723_p2), %s589_s1, 128  }
 0x1a4   : > { %2871 = vsyncadd (%p3723_p2), %s589_s1, 4294967168  ;;  %s3724_s5 = sld [smem:[#allocation42_spill]]  ;;  %s1959_s23 = sshll.u32 %s3449_s3, 2 }
 0x1a5   : > { %s601_s20 = scalar_lea.vmem [#allocation8], %s1959_s23 }
 0x1aa   : > { %s597_s6 = sand.u32 1, %s3724_s5  }
 0x1ab   : > { %s598_s27 = scalar_lea.sflag [#allocation9], %s597_s6 }
 0x1ac   : > { %2873 = dma.done.wait (%p3723_p2), %s598_s27, 64  }
 0x1ad   : > { %2875 = vsyncadd (%p3723_p2), %s598_s27, 4294967232  ;;  %p3725_p10 = scmp.eq.s32.totalorder %s3724_s5, 0 }
 0x1af   : > { %2877 = dma.done.wait (%p3725_p10), [#allocation9], 256   ;;  %p3726_p1 = pmov %p3725_p10 }
 0x1b1   : > { %2879 = vsyncadd (%p3726_p1), [#allocation9], 4294967040  ;;  %p3727_p5 = pmov %p3726_p1 }
 0x1b2   : > { %p3728_p8 = pmov %p3726_p1 }
 0x1b3   : > { %2881 = dma.done.wait (%p3727_p5), [#allocation12], 512  }
 0x1b4   : > { %2883 = vsyncadd (%p3728_p8), [#allocation12], 4294966784  ;;  %p3729_p3 = pmov %p3726_p1 }
 0x1b5   : > { %p3730_p11 = pmov %p3726_p1 }
 0x1b6   : > { %2885 = dma.done.wait (%p3729_p3), [#allocation15], 32  }
 0x1b7   : > { %2887 = vsyncadd (%p3730_p11), [#allocation15], 4294967264  ;;  %p3731_p6 = pmov %p3726_p1 }
 0x1b8   : > { %p3732_p13 = pmov %p3726_p1 }
 0x1b9   : > { %2889 = dma.done.wait (%p3731_p6), [#allocation18], 272  }
 0x1ba   : > { %2891 = vsyncadd (%p3732_p13), [#allocation18], 4294967024  ;;  %p3733_p4 = pmov %p3726_p1 }
 0x1bb   : > { %p3734_p9 = pmov %p3726_p1 }
 0x1bc   : > { %2893 = dma.done.wait (%p3733_p4), [#allocation21], 272  }
 0x1bd   : > { %2895 = vsyncadd (%p3734_p9), [#allocation21], 4294967024  ;;  %p3735_p0 = pmov %p3726_p1 }
 0x1bf   : > { %2897 = dma.done.wait (%p3735_p0), [#allocation24], 1040   ;;  %p3736_p7 = pmov %p3735_p0 }
 0x1c0   : > { %p3737_p12 = pmov %p3735_p0 }
 0x1c1   : > { %2899 = vsyncadd (%p3736_p7), [#allocation24], 4294966256 }
 0x1c2   : > { %2901 = dma.done.wait (%p3737_p12), [#allocation27], 16   ;;  %p3738_p2 = pmov %p3735_p0 }
 0x1c3   : > { %v2948_v0 = vmov 0.0   ;;  %vm2949_vm0 = vmmov 0   ;;  %v2366_v1 = vld [vmem:[#allocation11] sm:$0xff]   ;;  %v2367_v2 = vld [vmem:[#allocation11 + $0x8] sm:$0xff]   ;;  %vm728_vm1 = vcmask 261120   ;;  %v2368_v4 = vld [vmem:[#allocation13] sm:$0xff]  }
 0x1c4   : > { %2903 = vsyncadd (%p3738_p2), [#allocation27], 4294967280  ;;  %2060 = vmatprep.subr.bf16.mxu0 %v2948_v0  ;;  %2064 = vmatprep.mubr.msk.bf16.mxu0 %vm2949_vm0, %v2948_v0  ;;  %v704_v3 = vld [vmem:[%s601_s20] sm:$0xf]  ;;  %v2369_v5 = vld [vmem:[#allocation13 + $0x8] sm:$0xff]   ;;  %vm836_vm2 = vcmask 257024  }
 0x1c5   : > { %2084 = vmatprep.subr.bf16.mxu1 %v2948_v0  ;;  %2086 = vmatprep.mubr.msk.bf16.mxu1 %vm2949_vm0, %v2948_v0  ;;  %v2370_v6 = vld [vmem:[#allocation10] sm:$0xff]   ;;  %v2371_v7 = vld [vmem:[#allocation10 + $0x8] sm:$0xff]   ;;  %v1973_v10 = vld [vmem:[#allocation16] ss:$0 sm:$0xff]  ;;  %vm912_vm3 = vcmask 64512   ;;  %s2950_s19 = smov 112  }
 0x1c6   : > { %2061 = vmatpush3.bf16.msra.mxu0 %v2366_v1  ;;  %v3512_v8 = vld [vmem:[%s3455_s28] sm:$0xff]  ;;  %s2951_s0 = smov 120   ;;  %vm977_vm4 = vcmask 1043456   ;;  %s2952_s25 = smov 104   ;;  %vm1154_vm5 = vcmask 130112   ;;  %vm1284_vm6 = vcmask 195712  }
 0x1c7   : > { %2062 = vmatprep.subr.bf16.mxu0 %v2948_v0  ;;  %v841_v9 = vpack.c.bf16 %v3512_v8, %v3512_v8  ;;  %v1977_v17 = vld [vmem:[#allocation17] ss:$0 sm:$0xff]  ;;  %v1981_v28 = vld [vmem:[#allocation14] ss:$0 sm:$0xff]  ;;  %s2953_s14 = smov 8   ;;  %s2954_s24 = smov 16  }
 0x1c8   : > { %s2955_s7 = smov 24   ;;  %vm1414_vm7 = vcmask 261312   ;;  %s3739_s16 = sld [smem:[#allocation41_spill]] }
 0x1c9   : > { %s698_s28 = scalar_lea.vmem [#allocation28], %s1958_s26  ;;  %s3740_s27 = sld [smem:[#allocation52_spill]] }
 0x1ca   : > { %2063 = vmatpush3.bf16.msra.mxu0 %v2367_v2  ;;  %s1720_s5 = sshll.u32 %s698_s28, 4  ;;  %p3741_p1 = scmp.ne.s32.totalorder %s3714_s29, 0  ;;  %s3607_s5 = int_to_ptr.vmem [resolvable:$true] %s1720_s5 }
 0x1cb   : > { %2068 = vmatprep.subr.bf16.mxu0 %v2948_v0  ;;  %s2956_s26 = smov [#allocation28]  }
 0x1cd   : > { %2065 = vmatmul.mubr.msk.bf16.vlgmr.msra.gmra.mrb[0].mxu0 %vm728_vm1, %v704_v3 }
 0x1ce   : > { %2069 = vmatpush3.bf16.msra.mxu0 %v2368_v4  ;;  %2072 = vmatprep.mubr.msk.bf16.mxu0 %vm2949_vm0, %v2948_v0  ;;  %s2017_s1 = sshll.u32 %s3739_s16, 7 }
 0x1cf   : > { %2070 = vmatprep.subr.bf16.mxu0 %v2948_v0  ;;  %s3605_s20 = scalar_lea.hbm %s3740_s27, %s2017_s1 }
 0x1d2   : > { %2071 = vmatpush3.bf16.msra.mxu0 %v2369_v5 }
 0x1d3   : > { %2076 = vmatprep.subr.bf16.mxu0 %v2948_v0 }
 0x1d5   : > { %2073 = vmatmul.mubr.msk.bf16.vlgmr.msra.gmra.mrb[4].mxu0 %vm728_vm1, %v704_v3 }
 0x1d6   : > { %2077 = vmatpush3.bf16.msra.mxu0 %v2370_v6  ;;  %2080 = vmatprep.mubr.msk.bf16.mxu0 %vm2949_vm0, %v2948_v0 }
 0x1d7   : > { %2078 = vmatprep.subr.bf16.mxu0 %v2948_v0 }
 0x1da   : > { %2079 = vmatpush3.bf16.msra.mxu0 %v2371_v7 }
 0x1db   : > { %2090 = vmatprep.subr.bf16.mxu0 %v2948_v0 }
 0x1dd   : > { %2081 = vmatmul.mubr.msk.bf16.vlgmr.msra.gmra.mrb[8].mxu0 %vm728_vm1, %v841_v9 }
 0x1de   : > { %2092 = vmatprep.mubr.msk.bf16.mxu0 %vm2949_vm0, %v2948_v0 }
 0x2a0   : > { %v766_v11 = vpop.f32.mrb[0].mxu0 }
 0x2a1   : > { %v767_v12 = vadd.f32 %v1973_v10, %v766_v11  ;;  %v2066_v13 = vpop.f32.mrb[1].mxu0 }
 0x2a2   : > { %v769_v14 = vpop.f32.mrb[2].mxu0 }
 0x2a3   : > { %v835_v15 = vpack.c.bf16 %v767_v12, %v767_v12  ;;  %v2067_v16 = vpop.f32.mrb[3].mxu0 }
 0x2a5   : > { %837 = vst.msk [vmem:[#allocation2] sm:$0xf] %vm836_vm2, %v835_v15 }
 0x2a8   : > { %v829_v18 = vpop.f32.mrb[4].mxu0 }
 0x2a9   : > { %v830_v19 = vadd.f32 %v1977_v17, %v829_v18  ;;  %v2074_v20 = vpop.f32.mrb[5].mxu0 }
 0x2aa   : > { %v832_v21 = vpop.f32.mrb[6].mxu0 }
 0x2ab   : > { %v838_v22 = vpack.c.bf16 %v830_v19, %v830_v19  ;;  %v2075_v23 = vpop.f32.mrb[7].mxu0 }
 0x2ac   : > { %v910_v24 = vld [vmem:[#allocation2] sm:$0xf] }
 0x2ad   : > { %v2372_v25 = vld [vmem:[#allocation2] ss:$0 sps:$4 sm:$0xff]   ;;  %839 = vst.msk [vmem:[#allocation3] sm:$0xf] %vm836_vm2, %v838_v22  ;;  %v917_v26 = vsel %vm912_vm3, %v910_v24, 0 }
 0x2ae   : > { %v2373_v27 = vld [vmem:[#allocation2] ss:$0 sps:$4 sm:$0xff]   ;;  %2085 = vmatpush3.bf16.xpose.msra.mxu1 %v917_v26  ;;  %1163 = vrot.lane.b32.xlu1 %v2372_v25, %s2950_s19 }
 0x2af   : > { %1033 = vrot.lane.b32.xlu0 %v2373_v27, %s2951_s0  ;;  %2096 = vmatprep.subr.bf16.mxu1 %v2948_v0  ;;  %v2374_v37 = vld [vmem:[#allocation2] ss:$0 sps:$4 sm:$0xff]  }
 0x2b0   : > { %v903_v29 = vpop.f32.mrb[8].mxu0 }
 0x2b1   : > { %v904_v30 = vadd.f32 %v1981_v28, %v903_v29  ;;  %v2082_v31 = vpop.f32.mrb[9].mxu0 }
 0x2b2   : > { %v906_v32 = vpop.f32.mrb[10].mxu0 }
 0x2b3   : > { %v909_v33 = vpack.c.bf16 %v904_v30, %v904_v30  ;;  %v2083_v34 = vpop.f32.mrb[11].mxu0 }
 0x2b4   : > { %v911_v35 = vld [vmem:[#allocation3] sm:$0xf] }
 0x2b5   : > { %1158 = vrot.lane.b32.xlu1 %v909_v33, %s2950_s19  ;;  %1028 = vrot.lane.b32.xlu0 %v909_v33, %s2951_s0  ;;  %v979_v36 = vsel %vm977_vm4, %v911_v35, 0  ;;  %v2375_v2 = vld [vmem:[#allocation3] ss:$0 sps:$4 sm:$0xff]  }
 0x2b6   : > { %2087 = vmatmul.mubr.msk.bf16.vlgmr.msra.gmra.mrb[0].mxu1 %vm912_vm3, %v909_v33  ;;  %2091 = vmatpush3.bf16.msra.mxu0 %v979_v36  ;;  %v2376_v5 = vld [vmem:[#allocation3] ss:$0 sps:$4 sm:$0xff]  }
 0x2b7   : > { %2098 = vmatprep.mubr.msk.bf16.mxu1 %vm2949_vm0, %v2948_v0  ;;  %2102 = vmatprep.subr.bf16.mxu0 %v2948_v0  ;;  %v2377_v10 = vld [vmem:[#allocation3] ss:$0 sps:$4 sm:$0xff]  }
 0x2b9   : > { %1288 = vrot.lane.b32.xlu1 %v909_v33, %s2952_s25  ;;  %1293 = vrot.lane.b32.xlu0 %v2374_v37, %s2952_s25 }
 0x320   : > { %v1164_v40 = vpop.permute.xlu1 %1163 }
 0x321   : > { %v1034_v38 = vpop.permute.xlu0 %1033  ;;  %v1169_v42 = vsel %vm912_vm3, %v1164_v40, 0 }
 0x322   : > { %v1039_v39 = vsel %vm912_vm3, %v1034_v38, 0 }
 0x323   : > { %2097 = vmatpush3.bf16.xpose.msra.mxu1 %v1039_v39 }
 0x324   : > { %2108 = vmatprep.subr.bf16.mxu1 %v2948_v0 }
 0x327   : > { %v1029_v41 = vpop.permute.xlu0 %1028  ;;  %v1159_v44 = vpop.permute.xlu1 %1158 }
 0x32a   : > { %2099 = vmatmul.mubr.msk.bf16.vlgmr.msra.gmra.mrb[4].mxu1 %vm912_vm3, %v1029_v41 }
 0x32b   : > { %2109 = vmatpush3.bf16.xpose.msra.mxu1 %v1169_v42  ;;  %2110 = vmatprep.mubr.msk.bf16.mxu1 %vm2949_vm0, %v2948_v0  ;;  %v1294_v43 = vpop.permute.xlu0 %1293  ;;  %v1289_v46 = vpop.permute.xlu1 %1288 }
 0x32c   : > { %2120 = vmatprep.subr.bf16.mxu1 %v2948_v0  ;;  %v1299_v45 = vsel %vm912_vm3, %v1294_v43, 0 }
 0x332   : > { %2111 = vmatmul.mubr.msk.bf16.vlgmr.msra.gmra.mrb[8].mxu1 %vm912_vm3, %v1159_v44 }
 0x333   : > { %2121 = vmatpush3.bf16.xpose.msra.mxu1 %v1299_v45  ;;  %2122 = vmatprep.mubr.msk.bf16.mxu1 %vm2949_vm0, %v2948_v0 }
 0x334   : > { %2132 = vmatprep.subr.bf16.mxu1 %v2948_v0 }
 0x33a   : > { %2123 = vmatmul.mubr.msk.bf16.vlgmr.msra.gmra.mrb[12].mxu1 %vm912_vm3, %v1289_v46 }
 0x33b   : > { %2136 = vmatprep.mubr.msk.bf16.mxu1 %vm2949_vm0, %v2948_v0 }
 0x389   : > { %v953_v47 = vpop.f32.mrb[0].mxu1 }
 0x38a   : > { %v2088_v48 = vpop.f32.mrb[1].mxu1  ;;  %v959_v49 = vsel %vm912_vm3, %v953_v47, -inf }
 0x38b   : > { %960 = vmax.xlane.f32.xlu0 %v959_v49  ;;  %v956_v50 = vpop.f32.mrb[2].mxu1 }
 0x38c   : > { %v2089_v51 = vpop.f32.mrb[3].mxu1 }
 0x3fd   : > { %v1075_v52 = vpop.f32.mrb[4].mxu1 }
 0x3fe   : > { %v2100_v53 = vpop.f32.mrb[5].mxu1  ;;  %v1081_v54 = vsel %vm912_vm3, %v1075_v52, -inf }
 0x3ff   : > { %1082 = vmax.xlane.f32.xlu1 %v1081_v54  ;;  %v1078_v55 = vpop.f32.mrb[6].mxu1 }
 0x400   : > { %v2101_v56 = vpop.f32.mrb[7].mxu1 }
 0x405   : > { %v1205_v57 = vpop.f32.mrb[8].mxu1 }
 0x406   : > { %v2112_v58 = vpop.f32.mrb[9].mxu1  ;;  %v1211_v59 = vsel %vm912_vm3, %v1205_v57, -inf }
 0x407   : > { %1212 = vmax.xlane.f32.xlu0 %v1211_v59  ;;  %v1208_v60 = vpop.f32.mrb[10].mxu1 }
 0x408   : > { %v2113_v61 = vpop.f32.mrb[11].mxu1 }
 0x40d   : > { %v1335_v62 = vpop.f32.mrb[12].mxu1 }
 0x40e   : > { %v2124_v63 = vpop.f32.mrb[13].mxu1  ;;  %v1341_v1 = vsel %vm912_vm3, %v1335_v62, -inf }
 0x40f   : > { %1342 = vmax.xlane.f32.xlu0 %v1341_v1  ;;  %v1338_v3 = vpop.f32.mrb[14].mxu1 }
 0x410   : > { %1099 = vrot.lane.b32.xlu1 %v2375_v2, %s2951_s0  ;;  %v2125_v4 = vpop.f32.mrb[15].mxu1  ;;  %s2816_s0 = scalar_lea.vmem %s3607_s5, 128 }
 0x411   : > { %p2817_p10 = scmp.ne.s32.totalorder %s3607_s5, %s2816_s0 }
 0x413   : > { %p2818_p5 = pnand %p2817_p10, %p3741_p1 }
 0x414   : > { %1359 = vrot.lane.b32.xlu1 %v2376_v5, %s2952_s25  ;;  %s2820_s25 = sshll.u32 %s2956_s26, 4  ;;  %s2821_s25 = int_to_ptr.vmem [resolvable:$false] %s2820_s25 }
 0x415   : > { %p2819_p8 = pneg %p2818_p5  ;;  %p2823_p3 = scmp.lt.s32.totalorder %s3607_s5, %s2821_s25 }
 0x418   : > { %v961_v6 = vpop.xlane.xlu0 %960 }
 0x419   : > { %v965_v7 = vsub.f32 %v953_v47, %v961_v6  ;;  %v962_v42 = vsub.f32 -inf, %v961_v6 }
 0x41b   : > { %v966_v9 = vmul.f32 1.442695, %v965_v7  ;;  %v963_v43 = vmul.f32 1.442695, %v962_v42 }
 0x41d   : > { %2390 = vpow2.f32 %v966_v9 }
 0x425   : > { %1229 = vrot.lane.b32.xlu0 %v2377_v10, %s2950_s19  ;;  %s1706_s19 = scalar_lea.sflag [#allocation7], %s3449_s3 }
 0x427   : > { %v2391_v11 = vpop.eup %2390 }
 0x428   : > { %v973_v12 = vpack.c.bf16 %v2391_v11, %v2391_v11  ;;  %v969_v29 = vsel %vm912_vm3, %v2391_v11, 0.0 }
 0x42a   : > { %2093 = vmatmul.mubr.msk.bf16.vlgmr.msra.gmra.mrb[12].mxu0 %vm912_vm3, %v973_v12 }
 0x42b   : > { %2104 = vmatprep.mubr.msk.bf16.mxu0 %vm2949_vm0, %v2948_v0 }
 0x48c   : > { %v1083_v13 = vpop.xlane.xlu1 %1082 }
 0x48d   : > { %v1087_v14 = vsub.f32 %v1075_v52, %v1083_v13  ;;  %v1084_v52 = vsub.f32 -inf, %v1083_v13 }
 0x48f   : > { %v1088_v15 = vmul.f32 1.442695, %v1087_v14  ;;  %v1085_v53 = vmul.f32 1.442695, %v1084_v52 }
 0x490   : > { %v1100_v16 = vpop.permute.xlu1 %1099 }
 0x491   : > { %v1105_v17 = vsel %vm977_vm4, %v1100_v16, 0  ;;  %2392 = vpow2.f32 %v1088_v15  ;;  %v2378_v15 = vld [vmem:[#allocation19] sm:$0xff]  }
 0x492   : > { %2103 = vmatpush3.bf16.msra.mxu0 %v1105_v17  ;;  %2133 = vmatpush3.bf16.msra.mxu1 %v2378_v15 }
 0x493   : > { %2114 = vmatprep.subr.bf16.mxu0 %v2948_v0  ;;  %2134 = vmatprep.subr.bf16.mxu1 %v2948_v0 }
 0x494   : > { %v1213_v18 = vpop.xlane.xlu0 %1212  ;;  %v1360_v31 = vpop.permute.xlu1 %1359 }
 0x495   : > { %v1217_v19 = vsub.f32 %v1205_v57, %v1213_v18  ;;  %v1365_v34 = vsel %vm977_vm4, %v1360_v31, 0  ;;  %v1214_v54 = vsub.f32 -inf, %v1213_v18 }
 0x497   : > { %v1218_v20 = vmul.f32 1.442695, %v1217_v19  ;;  %v1215_v55 = vmul.f32 1.442695, %v1214_v54 }
 0x499   : > { %2394 = vpow2.f32 %v1218_v20  ;;  %v2379_v20 = vld [vmem:[#allocation19 + $0x8] sm:$0xff]  }
 0x49a   : > { %2135 = vmatpush3.bf16.msra.mxu1 %v2379_v20  ;;  %v2015_v20 = vld [vmem:[#allocation26] ss:$0 sm:$0xff] }
 0x49b   : > { %v2393_v21 = vpop.eup %2392  ;;  %2148 = vmatprep.subr.bf16.mxu1 %v2948_v0 }
 0x49c   : > { %v1343_v22 = vpop.xlane.xlu0 %1342  ;;  %v1091_v24 = vsel %vm912_vm3, %v2393_v21, 0.0  ;;  %v1095_v25 = vpack.c.bf16 %v2393_v21, %v2393_v21 }
 0x49d   : > { %v1347_v23 = vsub.f32 %v1335_v62, %v1343_v22  ;;  %1092 = vadd.xlane.f32.xlu1 %v1091_v24  ;;  %v1344_v56 = vsub.f32 -inf, %v1343_v22 }
 0x49e   : > { %2105 = vmatmul.mubr.msk.bf16.vlgmr.msra.gmra.mrb[16].mxu0 %vm912_vm3, %v1095_v25 }
 0x49f   : > { %v1348_v26 = vmul.f32 1.442695, %v1347_v23  ;;  %2116 = vmatprep.mubr.msk.bf16.mxu0 %vm2949_vm0, %v2948_v0  ;;  %v1345_v58 = vmul.f32 1.442695, %v1344_v56  ;;  %v2383_v56 = vld [vmem:[#allocation25 + $0x8] sm:$0xff]  }
 0x4a0   : > { %v1230_v27 = vpop.permute.xlu0 %1229 }
 0x4a1   : > { %v1235_v28 = vsel %vm977_vm4, %v1230_v27, 0  ;;  %2396 = vpow2.f32 %v1348_v26  ;;  %970 = vadd.xlane.f32.xlu1 %v969_v29 }
 0x4a2   : > { %2115 = vmatpush3.bf16.msra.mxu0 %v1235_v28  ;;  %2398 = vpow2.f32 %v963_v43 }
 0x4a3   : > { %2126 = vmatprep.subr.bf16.mxu0 %v2948_v0  ;;  %v2395_v30 = vpop.eup %2394 }
 0x4a4   : > { %v1221_v32 = vsel %vm912_vm3, %v2395_v30, 0.0  ;;  %v1225_v33 = vpack.c.bf16 %v2395_v30, %v2395_v30 }
 0x4a5   : > { %1222 = vadd.xlane.f32.xlu0 %v1221_v32 }
 0x4a6   : > { %2117 = vmatmul.mubr.msk.bf16.vlgmr.msra.gmra.mrb[20].mxu0 %vm912_vm3, %v1225_v33 }
 0x4a7   : > { %2127 = vmatpush3.bf16.msra.mxu0 %v1365_v34  ;;  %2128 = vmatprep.mubr.msk.bf16.mxu0 %vm2949_vm0, %v2948_v0 }
 0x4a8   : > { %2140 = vmatprep.subr.bf16.mxu0 %v2948_v0 }
 0x4ab   : > { %v2397_v35 = vpop.eup %2396 }
 0x4ac   : > { %v1351_v36 = vsel %vm912_vm3, %v2397_v35, 0.0  ;;  %v1355_v37 = vpack.c.bf16 %v2397_v35, %v2397_v35  ;;  %v2399_v44 = vpop.eup %2398  ;;  %v1999_v35 = vld [vmem:[#allocation20] ss:$0 sm:$0xff] }
 0x4ad   : > { %1352 = vadd.xlane.f32.xlu0 %v1351_v36  ;;  %v968_v46 = vmul.f32 0.0, %v2399_v44 }
 0x4ae   : > { %2129 = vmatmul.mubr.msk.bf16.vlgmr.msra.gmra.mrb[24].mxu0 %vm912_vm3, %v1355_v37 }
 0x4af   : > { %2144 = vmatprep.mubr.msk.bf16.mxu0 %vm2949_vm0, %v2948_v0 }
 0x4fd   : > { %v1015_v38 = vpop.f32.mrb[12].mxu0 }
 0x4fe   : > { %v2094_v39 = vpop.f32.mrb[13].mxu0  ;;  %v1021_v49 = vadd.f32 %v1015_v38, %v968_v46 }
 0x4ff   : > { %v1018_v40 = vpop.f32.mrb[14].mxu0 }
 0x500   : > { %v2095_v41 = vpop.f32.mrb[15].mxu0 }
 0x52a   : > { %v1093_v45 = vpop.xlane.xlu1 %1092 }
 0x52e   : > { %v971_v47 = vpop.xlane.xlu1 %970 }
 0x52f   : > { %v972_v48 = vadd.f32 %v971_v47, %v968_v46 }
 0x531   : > { %2400 = vrcp.f32 %v972_v48  ;;  %v2380_v48 = vld [vmem:[#allocation22] sm:$0xff]  }
 0x532   : > { %2402 = vpow2.f32 %v1085_v53  ;;  %v1223_v62 = vpop.xlane.xlu0 %1222  ;;  %2141 = vmatpush3.bf16.msra.mxu0 %v2380_v48 }
 0x533   : > { %2404 = vpow2.f32 %v1215_v55  ;;  %2142 = vmatprep.subr.bf16.mxu0 %v2948_v0 }
 0x534   : > { %2406 = vpow2.f32 %v1345_v58  ;;  %v2385_v58 = vld [vmem:[#allocation25 + $0x18] sm:$0xff]  }
 0x53a   : > { %v1353_v4 = vpop.xlane.xlu0 %1352 }
 0x53b   : > { %v2401_v50 = vpop.eup %2400 }
 0x53c   : > { %v1023_v51 = vmul.f32 %v2401_v50, %v1021_v49  ;;  %v2403_v57 = vpop.eup %2402  ;;  %v2381_v49 = vld [vmem:[#allocation22 + $0x8] sm:$0xff]   ;;  %v2382_v50 = vld [vmem:[#allocation25] sm:$0xff]  }
 0x53d   : > { %v1090_v59 = vmul.f32 0.0, %v2403_v57  ;;  %v2405_v61 = vpop.eup %2404  ;;  %2143 = vmatpush3.bf16.msra.mxu0 %v2381_v49  ;;  %v2384_v57 = vld [vmem:[#allocation25 + $0x10] sm:$0xff]  }
 0x53e   : > { %1024 = vst.msk [vmem:[#allocation4] sm:$0xff] %vm912_vm3, %v1023_v51  ;;  %v1220_v63 = vmul.f32 0.0, %v2405_v61  ;;  %v2407_v2 = vpop.eup %2406  ;;  %v2388_v61 = vld [vmem:[#allocation25 + $0x30] sm:$0xff]  }
 0x53f   : > { %v1094_v60 = vadd.f32 %v1093_v45, %v1090_v59  ;;  %v1350_v9 = vmul.f32 0.0, %v2407_v2 }
 0x540   : > { %v1224_v1 = vadd.f32 %v1223_v62, %v1220_v63  ;;  %v2389_v62 = vld [vmem:[#allocation25 + $0x38] sm:$0xff]  }
 0x541   : > { %2408 = vrcp.f32 %v1094_v60  ;;  %v1354_v13 = vadd.f32 %v1353_v4, %v1350_v9  ;;  %v2387_v60 = vld [vmem:[#allocation25 + $0x28] sm:$0xff]  }
 0x542   : > { %2410 = vrcp.f32 %v1224_v1 }
 0x543   : > { %2412 = vrcp.f32 %v1354_v13 }
 0x54b   : > { %v2409_v7 = vpop.eup %2408 }
 0x54c   : > { %v2411_v18 = vpop.eup %2410 }
 0x54d   : > { %v2413_v26 = vpop.eup %2412 }
 0x571   : > { %v1141_v3 = vpop.f32.mrb[16].mxu0 }
 0x572   : > { %v1147_v5 = vadd.f32 %v1141_v3, %v1090_v59  ;;  %v2106_v6 = vpop.f32.mrb[17].mxu0  ;;  %v2386_v59 = vld [vmem:[#allocation25 + $0x20] sm:$0xff]  }
 0x573   : > { %v1144_v10 = vpop.f32.mrb[18].mxu0 }
 0x574   : > { %v1149_v11 = vmul.f32 %v2409_v7, %v1147_v5  ;;  %v2107_v12 = vpop.f32.mrb[19].mxu0 }
 0x576   : > { %1151 = vrot.lane.b32.xlu0 %v1149_v11, %s2953_s14  ;;  %s2822_s14 = scalar_lea.vmem %s2821_s25, 256 }
 0x577   : > { %p2824_p11 = scmp.lt.s32.totalorder %s2822_s14, %s2816_s0 }
 0x579   : > { %v1271_v14 = vpop.f32.mrb[20].mxu0  ;;  %p2825_p6 = por %p2824_p11, %p2823_p3 }
 0x57a   : > { %v1277_v16 = vadd.f32 %v1271_v14, %v1220_v63  ;;  %v2118_v17 = vpop.f32.mrb[21].mxu0  ;;  %v2003_v63 = vld [vmem:[#allocation23] ss:$0 sm:$0xff] }
 0x57b   : > { %v1274_v19 = vpop.f32.mrb[22].mxu0  ;;  %p2826_p13 = pnand %p2825_p6, %p2819_p8 }
 0x57c   : > { %v1279_v21 = vmul.f32 %v2411_v18, %v1277_v16  ;;  %v2119_v22 = vpop.f32.mrb[23].mxu0 }
 0x57e   : > { %1281 = vrot.lane.b32.xlu1 %v1279_v21, %s2954_s24 }
 0x581   : > { %v1401_v23 = vpop.f32.mrb[24].mxu0 }
 0x582   : > { %v1407_v24 = vadd.f32 %v1401_v23, %v1350_v9  ;;  %v2130_v25 = vpop.f32.mrb[25].mxu0 }
 0x583   : > { %v1404_v27 = vpop.f32.mrb[26].mxu0 }
 0x584   : > { %v1409_v28 = vmul.f32 %v2413_v26, %v1407_v24  ;;  %v2131_v29 = vpop.f32.mrb[27].mxu0 }
 0x586   : > { %1411 = vrot.lane.b32.xlu1 %v1409_v28, %s2955_s7 }
 0x5e8   : > { %v1152_v30 = vpop.permute.xlu0 %1151 }
 0x5e9   : > { %1155 = vst.msk [vmem:[#allocation4] sm:$0xff] %vm1154_vm5, %v1152_v30 }
 0x5f0   : > { %v1282_v31 = vpop.permute.xlu1 %1281 }
 0x5f1   : > { %1285 = vst.msk [vmem:[#allocation4] sm:$0xff] %vm1284_vm6, %v1282_v31 }
 0x5f8   : > { %v1412_v32 = vpop.permute.xlu1 %1411 }
 0x5f9   : > { %1415 = vst.msk [vmem:[#allocation4] sm:$0xff] %vm1414_vm7, %v1412_v32 }
 0x600   : > { %v1416_v33 = vld [vmem:[#allocation4] sm:$0xff] }
 0x601   : > { %v1417_v34 = vpack.c.bf16 %v1416_v33, %v1416_v33 }
 0x603   : > { %2137 = vmatmul.mubr.msk.bf16.vlgmr.msra.gmra.mrb[16].mxu1 %vm728_vm1, %v1417_v34 }
 0x604   : > { %2164 = vmatprep.mubr.msk.bf16.mxu1 %vm2949_vm0, %v2948_v0  ;;  %2149 = vmatpush3.bf16.msra.mxu1 %v2382_v50 }
 0x605   : > { %2150 = vmatprep.subr.bf16.mxu1 %v2948_v0 }
 0x608   : > { %2151 = vmatpush3.bf16.msra.mxu1 %v2383_v56 }
 0x609   : > { %2152 = vmatprep.subr.bf16.mxu1 %v2948_v0 }
 0x60c   : > { %2153 = vmatpush3.bf16.msra.mxu1 %v2384_v57 }
 0x60d   : > { %2154 = vmatprep.subr.bf16.mxu1 %v2948_v0 }
 0x610   : > { %2155 = vmatpush3.bf16.msra.mxu1 %v2385_v58 }
 0x611   : > { %2156 = vmatprep.subr.bf16.mxu1 %v2948_v0 }
 0x614   : > { %2157 = vmatpush3.bf16.msra.mxu1 %v2386_v59 }
 0x615   : > { %2158 = vmatprep.subr.bf16.mxu1 %v2948_v0 }
 0x618   : > { %2159 = vmatpush3.bf16.msra.mxu1 %v2387_v60 }
 0x619   : > { %2160 = vmatprep.subr.bf16.mxu1 %v2948_v0 }
 0x61c   : > { %2161 = vmatpush3.bf16.msra.mxu1 %v2388_v61 }
 0x61d   : > { %2162 = vmatprep.subr.bf16.mxu1 %v2948_v0 }
 0x620   : > { %2163 = vmatpush3.bf16.msra.mxu1 %v2389_v62 }
 0x6d6   : > { %v1478_v36 = vpop.f32.mrb[16].mxu1 }
 0x6d7   : > { %v1479_v37 = vadd.f32 %v1999_v35, %v1478_v36  ;;  %v2138_v38 = vpop.f32.mrb[17].mxu1 }
 0x6d8   : > { %v1481_v39 = vpop.f32.mrb[18].mxu1 }
 0x6d9   : > { %v2139_v40 = vpop.f32.mrb[19].mxu1  ;;  %v1484_v41 = vadd.f32 %v1479_v37, %v3512_v8 }
 0x6db   : > { %v1485_v42 = vsel %vm728_vm1, %v1484_v41, 0.0 }
 0x6dc   : > { %1486 = vadd.xlane.f32.xlu0 %v1485_v42 }
 0x769   : > { %v1487_v43 = vpop.xlane.xlu0 %1486 }
 0x76a   : > { %v1489_v44 = vmul.f32 0.03125, %v1487_v43 }
 0x76c   : > { %v1490_v45 = vsub.f32 %v1484_v41, %v1489_v44 }
 0x76e   : > { %v1491_v46 = vmul.f32 %v1490_v45, %v1490_v45 }
 0x770   : > { %v1492_v47 = vsel %vm728_vm1, %v1491_v46, 0.0 }
 0x771   : > { %1493 = vadd.xlane.f32.xlu1 %v1492_v47 }
 0x7fe   : > { %v1494_v8 = vpop.xlane.xlu1 %1493 }
 0x7ff   : > { %v1495_v51 = vmul.f32 0.03125, %v1494_v8 }
 0x801   : > { %v1496_v52 = vadd.f32 1e-06, %v1495_v51 }
 0x803   : > { %2414 = vrsqrt.f32 %v1496_v52 }
 0x80d   : > { %v2415_v53 = vpop.eup %2414 }
 0x80e   : > { %v1498_v54 = vmul.f32 %v2415_v53, %v1490_v45 }
 0x810   : > { %v1499_v55 = vpack.c.bf16 %v1498_v54, %v1498_v54 }
 0x812   : > { %2145 = vmatmul.mubr.msk.bf16.vlgmr.msra.gmra.mrb[28].mxu0 %vm728_vm1, %v1499_v55 }
 0x8e5   : > { %v1560_v1 = vpop.f32.mrb[28].mxu0 }
 0x8e6   : > { %v1561_v2 = vadd.f32 %v2003_v63, %v1560_v1  ;;  %v2146_v3 = vpop.f32.mrb[29].mxu0 }
 0x8e7   : > { %v1563_v4 = vpop.f32.mrb[30].mxu0 }
 0x8e8   : > { %v1567_v5 = vmul.f32 0.044715, %v1561_v2  ;;  %v2147_v6 = vpop.f32.mrb[31].mxu0  ;;  %v1566_v13 = vmul.f32 0.5, %v1561_v2 }
 0x8ea   : > { %v1568_v7 = vmul.f32 %v1567_v5, %v1561_v2 }
 0x8ec   : > { %v1569_v9 = vmul.f32 %v1568_v7, %v1561_v2 }
 0x8ee   : > { %v1570_v10 = vadd.f32 %v1569_v9, %v1561_v2 }
 0x8f0   : > { %v1571_v11 = vmul.f32 0.7978846, %v1570_v10 }
 0x8f2   : > { %2416 = vtanh.f32 %v1571_v11 }
 0x8fc   : > { %v2417_v12 = vpop.eup %2416 }
 0x8fd   : > { %v1573_v14 = vadd.f32 1.0, %v2417_v12 }
 0x8ff   : > { %v1574_v15 = vmul.f32 %v1573_v14, %v1566_v13 }
 0x901   : > { %v1575_v16 = vpack.c.bf16 %v1574_v15, %v1574_v15 }
 0x903   : > { %2165 = vmatmul.mubr.bf16.vlgmr.msra.gmra.mrb[20].mxu1 %v1575_v16 }
 0x9d6   : > { %v1674_v0 = vpop.f32.mrb[20].mxu1 }
 0x9d7   : > { %1680 = vst.msk [vmem:[#allocation4] sm:$0xff] %vm728_vm1, %v1674_v0  ;;  %v2166_v17 = vpop.f32.mrb[21].mxu1 }
 0x9d8   : > { %v1677_v18 = vpop.f32.mrb[22].mxu1 }
 0x9d9   : > { %v2167_v19 = vpop.f32.mrb[23].mxu1 }
 0x9de   : > { %v1681_v21 = vld [vmem:[#allocation4] sm:$0xff] }
 0x9df   : > { %v1689_v22 = vadd.f32 %v2015_v20, %v1681_v21 }
 0x9e1   : > { %v1690_v23 = vadd.f32 %v1689_v22, %v1498_v54 }
 0x9e3   : > { %v1691_v24 = vsel %vm728_vm1, %v1690_v23, 0.0 }
 0x9e4   : > { %1692 = vadd.xlane.f32.xlu0 %v1691_v24 }
 0xa71   : > { %v1693_v25 = vpop.xlane.xlu0 %1692 }
 0xa72   : > { %v1694_v26 = vmul.f32 0.03125, %v1693_v25 }
 0xa74   : > { %v1695_v27 = vsub.f32 %v1690_v23, %v1694_v26 }
 0xa76   : > { %v1696_v28 = vmul.f32 %v1695_v27, %v1695_v27 }
 0xa78   : > { %v1697_v29 = vsel %vm728_vm1, %v1696_v28, 0.0 }
 0xa79   : > { %1698 = vadd.xlane.f32.xlu0 %v1697_v29 }
 0xb06   : > { %v1699_v30 = vpop.xlane.xlu0 %1698 }
 0xb07   : > { %v1700_v31 = vmul.f32 0.03125, %v1699_v30 }
 0xb09   : > { %v1701_v32 = vadd.f32 1e-06, %v1700_v31 }
 0xb0b   : > { %2418 = vrsqrt.f32 %v1701_v32 }
 0xb15   : > { %v2419_v33 = vpop.eup %2418 }
 0xb16   : > { %v1703_v34 = vmul.f32 %v2419_v33, %v1695_v27 }
 0xb18   : > { %1704 = vst.msk [vmem:[%s698_s28] sm:$0xff] %vm728_vm1, %v1703_v34 }
 0xb19   : > { %2829 = shalt.err (!%p2826_p13)
}
 0xb1a   : > { %s2830_s3 = scalar_lea.hbm %s3605_s20, 128  ;;  %s2834_s16 = scalar_lea.hbm %s3740_s27, 256 }
 0xb1b   : > { %p2831_p4 = scmp.ne.s32.totalorder %s3605_s20, %s2830_s3  ;;  %p2835_p7 = scmp.lt.u32.totalorder %s3605_s20, %s3740_s27 }
 0xb1c   : > { %p2836_p12 = scmp.lt.u32.totalorder %s2834_s16, %s2830_s3  ;;  %p2838_p10 = scmp.lt.u32.totalorder %s2830_s3, %s3605_s20 }
 0xb1d   : > { %p2832_p9 = pnand %p2831_p4, %p3741_p1 }
 0xb1e   : > { %p2837_p2 = por %p2836_p12, %p2835_p7 }
 0xb1f   : > { %p2833_p0 = pneg %p2832_p9 }
 0xb20   : > { %p2839_p5 = por %p2838_p10, %p2837_p2 }
 0xb22   : > { %p2840_p8 = pnand %p2839_p5, %p2833_p0 }
 0xb24   : > { %2843 = shalt.err (!%p2840_p8)
}
 0xb25   : > { %2220 = dma.vmem_to_hbm [thread:$0]  (%p3741_p1), %s3607_s5, 128, %s3605_s20, %s1706_s19  }
 0xb26 PF: > { %s3742_s6 = sld [smem:[#allocation39_spill]]  ;;  %p3743_p3 = scmp.ne.s32.totalorder %s3715_s30, 0 }
 0xb27   : > { %p3744_p11 = scmp.ge.s32.totalorder %s2930_s18, 2 }
 0xb29   : > { %p2267_p6 = pnand %p3744_p11, %p3743_p3 }
 0xb2c   : > { %s1732_s23 = sand.u32 1, %s3742_s6  }
 0xb2d   : > { %s1733_s0 = scalar_lea.sflag [#allocation7], %s1732_s23 }
 0xb2e   : > { %2905 = dma.done.wait (!%p2267_p6), %s1733_s0, 128  }
 0xb2f   : > { %2907 = vsyncadd (!%p2267_p6), %s1733_s0, 4294967168  ;;  %s39_s18 = sadd.s32 1, %s2930_s18   ;;  %s3745_s29 = sld [smem:[#allocation40_spill]] }
 0xb30   : > { %p36_p13 = scmp.ge.s32.totalorder %s39_s18, 4   ;;  %s3746_s30 = smov %s2918_s15 }
 0xb31   : > { %s3747_s15 = smov %s3366_s21  ;;  %s3748_s16 = smov %s2926_s17 }
 0xb32   : > { %s3749_s17 = smov %s3751_s2  ;;  %38 = sbr.rel (!%p36_p13) target bundleno = 24 (0x18), region = 186 }
 0xb39   :  { %1738 = vsyncpa [#allocation6], 1 }
 0xb3a   :  { %1740 = vsyncpa [#allocation6 + $0x1], 1 }
 0xb3b   :  { %1741 = vsyncpa [#allocation9], 1 }
 0xb3c   :  { %1743 = vsyncpa [#allocation9 + $0x1], 1 }
 0xb3d   :  { %1744 = vsyncpa [#allocation12], 1 }
 0xb3e   :  { %1745 = vsyncpa [#allocation15], 1 }
 0xb3f   :  { %1746 = vsyncpa [#allocation18], 1 }
 0xb40   :  { %1747 = vsyncpa [#allocation21], 1 }
 0xb41   :  { %1748 = vsyncpa [#allocation24], 1 }
 0xb42   :  { %1749 = vsyncpa [#allocation27], 1 }
 0xb43   :  { %1750 = vsyncpa [#allocation7], 1 }
 0xb44   :  { %1752 = vsyncpa [#allocation7 + $0x1], 1 }

</bundles_post_ra>
